<compile_context>
chip_gen: v6e
topology: v6e:2x2x1
jax: 0.10.0
libtpu: 0.0.40
codegen_flags: <defaults>
</compile_context>

<pallas_src>
import numpy as np
import jax
import jax.numpy as jnp
from jax import lax
from jax.experimental import pallas as pl
from jax.experimental.pallas import tpu as pltpu

NB = 8   # samples packed along the lane axis per grid step (8 * W=16 -> 128 lanes)


# ---------------------------------------------------------------------------
# Host-side construction of the structured matmul operands (done ONCE)
# ---------------------------------------------------------------------------
def _conv_left(w, h):
    """(3, Cout*h, Cin*h): channel + row-tap contraction of Conv2d(k=3, pad=1),
    one matrix per column tap dj (row zero-padding encoded by omitted entries)."""
    cout, cin, _, _ = w.shape
    mats = np.zeros((3, cout * h, cin * h), np.float32)
    for dj in range(3):
        for co in range(cout):
            for ci in range(cin):
                for di in range(3):
                    for u in range(h):
                        v = u + di - 1                      # input row feeding output row u
                        if 0 <= v < h:
                            mats[dj, co * h + u, ci * h + v] = w[co, ci, di, dj]
    return mats


def _convt_left(w, h_in):
    """(4, Cout*2h, Cin*h): channel + row placement of ConvTranspose2d(k=4,s=2,p=1),
    one matrix per column tap kj."""
    cin, cout, _, _ = w.shape
    h_out = 2 * h_in
    mats = np.zeros((4, cout * h_out, cin * h_in), np.float32)
    for kj in range(4):
        for co in range(cout):
            for ci in range(cin):
                for m in range(h_out):
                    for a in range(h_in):
                        ki = m + 1 - 2 * a                  # m = 2a - 1 + ki
                        if 0 <= ki < 4:
                            mats[kj, co * h_out + m, ci * h_in + a] = w[ci, co, ki, kj]
    return mats


def _conv_right(w_sp, nb):
    """(3, nb*w, nb*w): per-sample block-diag column shift (with zero pad) for a 3-tap conv."""
    eye = np.eye(nb, dtype=np.float32)
    out = []
    for dj in range(3):
        s = np.zeros((w_sp, w_sp), np.float32)
        for j_out in range(w_sp):
            j_in = j_out + dj - 1
            if 0 <= j_in < w_sp:
                s[j_in, j_out] = 1.0
        out.append(np.kron(eye, s))
    return np.stack(out)


def _pool_cols(w_sp, nb):
    """(2, nb*w, nb*w/2): per-sample block-diag column selectors of the 2x2 max-pool."""
    eye = np.eye(nb, dtype=np.float32)
    out = []
    for p in range(2):
        s = np.zeros((w_sp, w_sp // 2), np.float32)
        for j_out in range(w_sp // 2):
            s[2 * j_out + p, j_out] = 1.0
        out.append(np.kron(eye, s))
    return np.stack(out)


def _pool_rows(h_sp, c):
    """(2, c*h/2, c*h): per-channel block-diag row selectors of the 2x2 max-pool."""
    eye = np.eye(c, dtype=np.float32)
    out = []
    for p in range(2):
        s = np.zeros((h_sp // 2, h_sp), np.float32)
        for u_out in range(h_sp // 2):
            s[u_out, 2 * u_out + p] = 1.0
        out.append(np.kron(eye, s))
    return np.stack(out)


def _convt_right(w_in, nb):
    """(4, nb*w_in, nb*2*w_in): per-sample block-diag stride-2 column interleave."""
    eye = np.eye(nb, dtype=np.float32)
    w_out = 2 * w_in
    out = []
    for kj in range(4):
        s = np.zeros((w_in, w_out), np.float32)
        for n in range(w_out):
            num = n + 1 - kj                                # n = 2b - 1 + kj
            if num % 2 == 0:
                b = num // 2
                if 0 <= b < w_in:
                    s[b, n] = 1.0
        out.append(np.kron(eye, s))
    return np.stack(out)


def _bias_col(b, h):
    """(C*h, 1) channel-major bias column (broadcast along lanes in-kernel)."""
    return np.repeat(np.asarray(b, np.float32), h).reshape(-1, 1)


def _flat_taps(stacked):
    """Concatenate the per-tap left matrices vertically -> one tall MXU matmul."""
    return stacked.reshape(-1, stacked.shape[-1])


OPERANDS = ("L1", "R1", "P1c", "P1r", "B1",
            "L2", "R2", "P2c", "P2r", "B2",
            "LT1", "RT1", "BT1",
            "LT2", "RT2", "BT2")


def prepare_operands(params, h, w, nb=NB):
    """Pre-scatter the PyTorch-layout weights into the MXU operand matrices."""
    p = {k: np.asarray(v, np.float32) for k, v in params.items()}
    h2, w2, h4, w4 = h // 2, w // 2, h // 4, w // 4
    ops = {
        # stage 1: Conv2d(1,3,3,1,1) -> MaxPool2d(2) -> ReLU
        "L1": _flat_taps(_conv_left(p["w1"], h)),        # (3*3h, h)      = (144, 16)
        "R1": _conv_right(w, nb),                        # (3, 128, 128)
        "P1c": _pool_cols(w, nb),                        # (2, 128, 64)
        "P1r": _pool_rows(h, 3),                         # (2, 24, 48)
        "B1": _bias_col(p["b1"], h),                     # (48, 1)
        # stage 2: Conv2d(3,6,3,1,1) -> MaxPool2d(2) -> ReLU
        "L2": _flat_taps(_conv_left(p["w2"], h2)),       # (144, 24)
        "R2": _conv_right(w2, nb),                       # (3, 64, 64)
        "P2c": _pool_cols(w2, nb),                       # (2, 64, 32)
        "P2r": _pool_rows(h2, 6),                        # (2, 24, 48)
        "B2": _bias_col(p["b2"], h2),                    # (48, 1)
        # stage 3: ConvTranspose2d(6,3,4,2,1) -> ReLU
        "LT1": _flat_taps(_convt_left(p["wt1"], h4)),    # (96, 24)
        "RT1": _convt_right(w4, nb),                     # (4, 32, 64)
        "BT1": _bias_col(p["bt1"], h2),                  # (24, 1)
        # stage 4: ConvTranspose2d(3,1,4,2,1)
        "LT2": _flat_taps(_convt_left(p["wt2"], h2)),    # (64, 24)
        "RT2": _convt_right(w2, nb),                     # (4, 64, 128)
        "BT2": _bias_col(p["bt2"], h),                   # (16, 1)
    }
    return {k: jnp.asarray(v) for k, v in ops.items()}


# ---------------------------------------------------------------------------
# Fused kernel: the whole forward pass for one lane-packed block of NB samples
# ---------------------------------------------------------------------------
def _fused_kernel(L1, R1, P1c, P1r, B1,
                  L2, R2, P2c, P2r, B2,
                  LT1, RT1, BT1,
                  LT2, RT2, BT2,
                  x_ref, o_ref):
    def mm(a, b):
        return jnp.dot(a, b, preferred_element_type=jnp.float32)

    def conv_pool_relu(act, lcat, r, pc, pr, bias):
        rows = lcat.shape[0] // 3
        zc = mm(lcat[...], act)                           # all 3 column taps in one matmul
        z = bias[...]
        for dj in range(3):
            z = z + mm(zc[dj * rows:(dj + 1) * rows], r[dj])
        cm = jnp.maximum(mm(z, pc[0]), mm(z, pc[1]))      # 2x2 max-pool, columns
        rm = jnp.maximum(mm(pr[0], cm), mm(pr[1], cm))    # 2x2 max-pool, rows
        return jnp.maximum(rm, 0.0)                       # ReLU

    def conv_transpose(act, lcat, r, bias):
        rows = lcat.shape[0] // 4
        zc = mm(lcat[...], act)                           # all 4 column taps in one matmul
        z = bias[...]
        for kj in range(4):
            z = z + mm(zc[kj * rows:(kj + 1) * rows], r[kj])
        return z

    a1 = conv_pool_relu(x_ref[0, :, :], L1, R1, P1c, P1r, B1)   # (3*H/2, NB*W/2)
    a2 = conv_pool_relu(a1, L2, R2, P2c, P2r, B2)               # (6*H/4, NB*W/4)
    a3 = jnp.maximum(conv_transpose(a2, LT1, RT1, BT1), 0.0)    # (3*H/2, NB*W/2)
    o_ref[0, :, :] = conv_transpose(a3, LT2, RT2, BT2)          # (H, NB*W)


# ---------------------------------------------------------------------------
# Wrapper: lane-pack the batch, call the kernel, unpack
# ---------------------------------------------------------------------------
@jax.jit
def my_model(x, ops):
    nb = NB
    n, c, h, w = x.shape
    assert c == 1 and h % 4 == 0 and w % 4 == 0
    g = pl.cdiv(n, nb)
    n_pad = g * nb

    xs = x.astype(jnp.float32).reshape(n, h, w)
    if n_pad != n:
        xs = jnp.concatenate([xs, jnp.zeros((n_pad - n, h, w), jnp.float32)], axis=0)
    # lane-pack: sample s of a block owns lanes [s*w, (s+1)*w)
    xs = xs.reshape(g, nb, h, w).transpose(0, 2, 1, 3).reshape(g, h, nb * w)

    def full(arr):
        nd = arr.ndim
        return pl.BlockSpec(arr.shape, lambda i, _nd=nd: (0,) * _nd)

    operands = [ops[k] for k in OPERANDS]
    in_specs = [full(a) for a in operands] + [
        pl.BlockSpec((1, h, nb * w), lambda i: (i, 0, 0))]

    out = pl.pallas_call(
        _fused_kernel,
        out_shape=jax.ShapeDtypeStruct((g, h, nb * w), jnp.float32),
        grid=(g,),
        in_specs=in_specs,
        out_specs=pl.BlockSpec((1, h, nb * w), lambda i: (i, 0, 0)),
        compiler_params=pltpu.CompilerParams(dimension_semantics=("parallel",)),
    )(*operands, xs)

    y = out.reshape(g, h, nb, w).transpose(0, 2, 1, 3).reshape(n_pad, 1, h, w)
    return y[:n]


# ------------------------- parameters & pure-XLA reference -----------------------
def init_params(key):
    ks = jax.random.split(key, 8)

    def u(k, shape, fan_in):
        bound = 1.0 / np.sqrt(fan_in)
        return jax.random.uniform(k, shape, jnp.float32, -bound, bound)

    return {
        "w1": u(ks[0], (3, 1, 3, 3), 1 * 9),   "b1": u(ks[1], (3,), 1 * 9),
        "w2": u(ks[2], (6, 3, 3, 3), 3 * 9),   "b2": u(ks[3], (6,), 3 * 9),
        "wt1": u(ks[4], (6, 3, 4, 4), 6 * 16), "bt1": u(ks[5], (3,), 6 * 16),
        "wt2": u(ks[6], (3, 1, 4, 4), 3 * 16), "bt2": u(ks[7], (1,), 3 * 16),
    }


def ref_model(x, p):
    dn = ("NCHW", "OIHW", "NCHW")

    def conv(x, w, b, pad):
        y = lax.conv_general_dilated(x, w, (1, 1), [(pad, pad)] * 2, dimension_numbers=dn)
        return y + b[None, :, None, None]

    def pool_relu(x):
        y = lax.reduce_window(x, -jnp.inf, lax.max, (1, 1, 2, 2), (1, 1, 2, 2), "VALID")
        return jnp.maximum(y, 0.0)

    def convT(x, w, b, stride, pad):
        k = w.shape[2]
        wc = jnp.transpose(w, (1, 0, 2, 3))[:, :, ::-1, ::-1]
        y = lax.conv_general_dilated(x, wc, (1, 1), [(k - 1 - pad, k - 1 - pad)] * 2,
                                     lhs_dilation=(stride, stride), dimension_numbers=dn)
        return y + b[None, :, None, None]

    y = pool_relu(conv(x, p["w1"], p["b1"], 1))
    y = pool_relu(conv(y, p["w2"], p["b2"], 1))
    y = jnp.maximum(convT(y, p["wt1"], p["bt1"], 2, 1), 0.0)
    y = convT(y, p["wt2"], p["bt2"], 2, 1)
    return y


if __name__ == "__main__":
    root = jax.random.PRNGKey(0)
    pkey, xkey = jax.random.split(root)
    params = init_params(pkey)

    H = W = 16
    N = 16                                    # 2 lane-packed grid steps of NB=8 samples
    ops = prepare_operands(params, H, W, NB)
    x = jax.random.normal(xkey, (N, 1, H, W), jnp.float32)

    out = jax.block_until_ready(my_model(x, ops))
    assert out.shape == (N, 1, H, W), out.shape

    ref = jax.block_until_ready(ref_model(x, params))
    np.testing.assert_allclose(np.asarray(out), np.asarray(ref), atol=1e-4, rtol=1e-3)
    print("KERNEL_OK")
</pallas_src>

<mosaic_0001>
module attributes {stable_mosaic.version = 11 : i64} {
  func.func @_fused_kernel(%arg0: i32, %arg1: memref<144x16xf32, #tpu.memory_space<vmem>>, %arg2: memref<3x128x128xf32, #tpu.memory_space<vmem>>, %arg3: memref<2x128x64xf32, #tpu.memory_space<vmem>>, %arg4: memref<2x24x48xf32, #tpu.memory_space<vmem>>, %arg5: memref<48x1xf32, #tpu.memory_space<vmem>>, %arg6: memref<144x24xf32, #tpu.memory_space<vmem>>, %arg7: memref<3x64x64xf32, #tpu.memory_space<vmem>>, %arg8: memref<2x64x32xf32, #tpu.memory_space<vmem>>, %arg9: memref<2x24x48xf32, #tpu.memory_space<vmem>>, %arg10: memref<48x1xf32, #tpu.memory_space<vmem>>, %arg11: memref<96x24xf32, #tpu.memory_space<vmem>>, %arg12: memref<4x32x64xf32, #tpu.memory_space<vmem>>, %arg13: memref<24x1xf32, #tpu.memory_space<vmem>>, %arg14: memref<64x24xf32, #tpu.memory_space<vmem>>, %arg15: memref<4x64x128xf32, #tpu.memory_space<vmem>>, %arg16: memref<16x1xf32, #tpu.memory_space<vmem>>, %arg17: memref<1x16x128xf32, #tpu.memory_space<vmem>>, %arg18: memref<1x16x128xf32, #tpu.memory_space<vmem>>) attributes {dimension_semantics = [#tpu.dimension_semantics<parallel>], iteration_bounds = array<i64: 2>, scalar_prefetch = 0 : i64, scratch_operands = 0 : i64, tpu.core_type = #tpu.core_type<tc>, window_params = [{pipeline_mode = #tpu.pipeline_mode<synchronous>, transform_indices = @transform_0, window_bounds = array<i64: 144, 16>}, {pipeline_mode = #tpu.pipeline_mode<synchronous>, transform_indices = @transform_1, window_bounds = array<i64: 3, 128, 128>}, {pipeline_mode = #tpu.pipeline_mode<synchronous>, transform_indices = @transform_2, window_bounds = array<i64: 2, 128, 64>}, {pipeline_mode = #tpu.pipeline_mode<synchronous>, transform_indices = @transform_3, window_bounds = array<i64: 2, 24, 48>}, {pipeline_mode = #tpu.pipeline_mode<synchronous>, transform_indices = @transform_4, window_bounds = array<i64: 48, 1>}, {pipeline_mode = #tpu.pipeline_mode<synchronous>, transform_indices = @transform_5, window_bounds = array<i64: 144, 24>}, {pipeline_mode = #tpu.pipeline_mode<synchronous>, transform_indices = @transform_6, window_bounds = array<i64: 3, 64, 64>}, {pipeline_mode = #tpu.pipeline_mode<synchronous>, transform_indices = @transform_7, window_bounds = array<i64: 2, 64, 32>}, {pipeline_mode = #tpu.pipeline_mode<synchronous>, transform_indices = @transform_8, window_bounds = array<i64: 2, 24, 48>}, {pipeline_mode = #tpu.pipeline_mode<synchronous>, transform_indices = @transform_9, window_bounds = array<i64: 48, 1>}, {pipeline_mode = #tpu.pipeline_mode<synchronous>, transform_indices = @transform_10, window_bounds = array<i64: 96, 24>}, {pipeline_mode = #tpu.pipeline_mode<synchronous>, transform_indices = @transform_11, window_bounds = array<i64: 4, 32, 64>}, {pipeline_mode = #tpu.pipeline_mode<synchronous>, transform_indices = @transform_12, window_bounds = array<i64: 24, 1>}, {pipeline_mode = #tpu.pipeline_mode<synchronous>, transform_indices = @transform_13, window_bounds = array<i64: 64, 24>}, {pipeline_mode = #tpu.pipeline_mode<synchronous>, transform_indices = @transform_14, window_bounds = array<i64: 4, 64, 128>}, {pipeline_mode = #tpu.pipeline_mode<synchronous>, transform_indices = @transform_15, window_bounds = array<i64: 16, 1>}, {transform_indices = @transform_16, window_bounds = array<i64: 1, 16, 128>}, {transform_indices = @transform_17, window_bounds = array<i64: 1, 16, 128>}]} {
    %c0 = arith.constant 0 : index
    %c0_0 = arith.constant 0 : index
    %c0_1 = arith.constant 0 : index
    %0 = vector.load %arg17[%c0, %c0_0, %c0_1] : memref<1x16x128xf32, #tpu.memory_space<vmem>>, vector<1x16x128xf32>
    %1 = vector.shape_cast %0 : vector<1x16x128xf32> to vector<16x128xf32>
    %c0_2 = arith.constant 0 : index
    %c0_3 = arith.constant 0 : index
    %2 = vector.load %arg1[%c0_2, %c0_3] : memref<144x16xf32, #tpu.memory_space<vmem>>, vector<144x16xf32>
    %cst = arith.constant dense<0.000000e+00> : vector<144x128xf32>
    %3 = tpu.matmul %2, %1, %cst {dimension_numbers = #tpu.dot_dimension_numbers<[1], [0], [0], [1], [0, 0, 1, 1], [], []>} : vector<144x16xf32>, vector<16x128xf32>, vector<144x128xf32> -> vector<144x128xf32>
    %c0_4 = arith.constant 0 : index
    %c0_5 = arith.constant 0 : index
    %4 = vector.load %arg5[%c0_4, %c0_5] : memref<48x1xf32, #tpu.memory_space<vmem>>, vector<48x1xf32>
    %5 = vector.extract_strided_slice %3 {offsets = [0, 0], sizes = [48, 128], strides = [1, 1]} : vector<144x128xf32> to vector<48x128xf32>
    %c0_6 = arith.constant 0 : index
    %c0_7 = arith.constant 0 : index
    %c0_8 = arith.constant 0 : index
    %6 = vector.load %arg2[%c0_6, %c0_7, %c0_8] : memref<3x128x128xf32, #tpu.memory_space<vmem>>, vector<1x128x128xf32>
    %7 = vector.shape_cast %6 : vector<1x128x128xf32> to vector<128x128xf32>
    %cst_9 = arith.constant dense<0.000000e+00> : vector<48x128xf32>
    %8 = tpu.matmul %5, %7, %cst_9 {dimension_numbers = #tpu.dot_dimension_numbers<[1], [0], [0], [1], [0, 0, 1, 1], [], []>} : vector<48x128xf32>, vector<128x128xf32>, vector<48x128xf32> -> vector<48x128xf32>
    %9 = vector.broadcast %4 : vector<48x1xf32> to vector<48x128xf32>
    %10 = arith.addf %9, %8 : vector<48x128xf32>
    %11 = vector.extract_strided_slice %3 {offsets = [48, 0], sizes = [48, 128], strides = [1, 1]} : vector<144x128xf32> to vector<48x128xf32>
    %c1 = arith.constant 1 : index
    %c0_10 = arith.constant 0 : index
    %c0_11 = arith.constant 0 : index
    %12 = vector.load %arg2[%c1, %c0_10, %c0_11] : memref<3x128x128xf32, #tpu.memory_space<vmem>>, vector<1x128x128xf32>
    %13 = vector.shape_cast %12 : vector<1x128x128xf32> to vector<128x128xf32>
    %cst_12 = arith.constant dense<0.000000e+00> : vector<48x128xf32>
    %14 = tpu.matmul %11, %13, %cst_12 {dimension_numbers = #tpu.dot_dimension_numbers<[1], [0], [0], [1], [0, 0, 1, 1], [], []>} : vector<48x128xf32>, vector<128x128xf32>, vector<48x128xf32> -> vector<48x128xf32>
    %15 = arith.addf %10, %14 : vector<48x128xf32>
    %16 = vector.extract_strided_slice %3 {offsets = [96, 0], sizes = [48, 128], strides = [1, 1]} : vector<144x128xf32> to vector<48x128xf32>
    %c2 = arith.constant 2 : index
    %c0_13 = arith.constant 0 : index
    %c0_14 = arith.constant 0 : index
    %17 = vector.load %arg2[%c2, %c0_13, %c0_14] : memref<3x128x128xf32, #tpu.memory_space<vmem>>, vector<1x128x128xf32>
    %18 = vector.shape_cast %17 : vector<1x128x128xf32> to vector<128x128xf32>
    %cst_15 = arith.constant dense<0.000000e+00> : vector<48x128xf32>
    %19 = tpu.matmul %16, %18, %cst_15 {dimension_numbers = #tpu.dot_dimension_numbers<[1], [0], [0], [1], [0, 0, 1, 1], [], []>} : vector<48x128xf32>, vector<128x128xf32>, vector<48x128xf32> -> vector<48x128xf32>
    %20 = arith.addf %15, %19 : vector<48x128xf32>
    %c0_16 = arith.constant 0 : index
    %c0_17 = arith.constant 0 : index
    %c0_18 = arith.constant 0 : index
    %21 = vector.load %arg3[%c0_16, %c0_17, %c0_18] : memref<2x128x64xf32, #tpu.memory_space<vmem>>, vector<1x128x64xf32>
    %22 = vector.shape_cast %21 : vector<1x128x64xf32> to vector<128x64xf32>
    %cst_19 = arith.constant dense<0.000000e+00> : vector<48x64xf32>
    %23 = tpu.matmul %20, %22, %cst_19 {dimension_numbers = #tpu.dot_dimension_numbers<[1], [0], [0], [1], [0, 0, 1, 1], [], []>} : vector<48x128xf32>, vector<128x64xf32>, vector<48x64xf32> -> vector<48x64xf32>
    %c1_20 = arith.constant 1 : index
    %c0_21 = arith.constant 0 : index
    %c0_22 = arith.constant 0 : index
    %24 = vector.load %arg3[%c1_20, %c0_21, %c0_22] : memref<2x128x64xf32, #tpu.memory_space<vmem>>, vector<1x128x64xf32>
    %25 = vector.shape_cast %24 : vector<1x128x64xf32> to vector<128x64xf32>
    %cst_23 = arith.constant dense<0.000000e+00> : vector<48x64xf32>
    %26 = tpu.matmul %20, %25, %cst_23 {dimension_numbers = #tpu.dot_dimension_numbers<[1], [0], [0], [1], [0, 0, 1, 1], [], []>} : vector<48x128xf32>, vector<128x64xf32>, vector<48x64xf32> -> vector<48x64xf32>
    %27 = arith.maximumf %23, %26 : vector<48x64xf32>
    %c0_24 = arith.constant 0 : index
    %c0_25 = arith.constant 0 : index
    %c0_26 = arith.constant 0 : index
    %28 = vector.load %arg4[%c0_24, %c0_25, %c0_26] : memref<2x24x48xf32, #tpu.memory_space<vmem>>, vector<1x24x48xf32>
    %29 = vector.shape_cast %28 : vector<1x24x48xf32> to vector<24x48xf32>
    %cst_27 = arith.constant dense<0.000000e+00> : vector<24x64xf32>
    %30 = tpu.matmul %29, %27, %cst_27 {dimension_numbers = #tpu.dot_dimension_numbers<[1], [0], [0], [1], [0, 0, 1, 1], [], []>} : vector<24x48xf32>, vector<48x64xf32>, vector<24x64xf32> -> vector<24x64xf32>
    %c1_28 = arith.constant 1 : index
    %c0_29 = arith.constant 0 : index
    %c0_30 = arith.constant 0 : index
    %31 = vector.load %arg4[%c1_28, %c0_29, %c0_30] : memref<2x24x48xf32, #tpu.memory_space<vmem>>, vector<1x24x48xf32>
    %32 = vector.shape_cast %31 : vector<1x24x48xf32> to vector<24x48xf32>
    %cst_31 = arith.constant dense<0.000000e+00> : vector<24x64xf32>
    %33 = tpu.matmul %32, %27, %cst_31 {dimension_numbers = #tpu.dot_dimension_numbers<[1], [0], [0], [1], [0, 0, 1, 1], [], []>} : vector<24x48xf32>, vector<48x64xf32>, vector<24x64xf32> -> vector<24x64xf32>
    %34 = arith.maximumf %30, %33 : vector<24x64xf32>
    %cst_32 = arith.constant 0.000000e+00 : f32
    %35 = vector.broadcast %cst_32 : f32 to vector<24x64xf32>
    %36 = arith.maximumf %34, %35 : vector<24x64xf32>
    %c0_33 = arith.constant 0 : index
    %c0_34 = arith.constant 0 : index
    %37 = vector.load %arg6[%c0_33, %c0_34] : memref<144x24xf32, #tpu.memory_space<vmem>>, vector<144x24xf32>
    %cst_35 = arith.constant dense<0.000000e+00> : vector<144x64xf32>
    %38 = tpu.matmul %37, %36, %cst_35 {dimension_numbers = #tpu.dot_dimension_numbers<[1], [0], [0], [1], [0, 0, 1, 1], [], []>} : vector<144x24xf32>, vector<24x64xf32>, vector<144x64xf32> -> vector<144x64xf32>
    %c0_36 = arith.constant 0 : index
    %c0_37 = arith.constant 0 : index
    %39 = vector.load %arg10[%c0_36, %c0_37] : memref<48x1xf32, #tpu.memory_space<vmem>>, vector<48x1xf32>
    %40 = vector.extract_strided_slice %38 {offsets = [0, 0], sizes = [48, 64], strides = [1, 1]} : vector<144x64xf32> to vector<48x64xf32>
    %c0_38 = arith.constant 0 : index
    %c0_39 = arith.constant 0 : index
    %c0_40 = arith.constant 0 : index
    %41 = vector.load %arg7[%c0_38, %c0_39, %c0_40] : memref<3x64x64xf32, #tpu.memory_space<vmem>>, vector<1x64x64xf32>
    %42 = vector.shape_cast %41 : vector<1x64x64xf32> to vector<64x64xf32>
    %cst_41 = arith.constant dense<0.000000e+00> : vector<48x64xf32>
    %43 = tpu.matmul %40, %42, %cst_41 {dimension_numbers = #tpu.dot_dimension_numbers<[1], [0], [0], [1], [0, 0, 1, 1], [], []>} : vector<48x64xf32>, vector<64x64xf32>, vector<48x64xf32> -> vector<48x64xf32>
    %44 = vector.broadcast %39 : vector<48x1xf32> to vector<48x64xf32>
    %45 = arith.addf %44, %43 : vector<48x64xf32>
    %46 = vector.extract_strided_slice %38 {offsets = [48, 0], sizes = [48, 64], strides = [1, 1]} : vector<144x64xf32> to vector<48x64xf32>
    %c1_42 = arith.constant 1 : index
    %c0_43 = arith.constant 0 : index
    %c0_44 = arith.constant 0 : index
    %47 = vector.load %arg7[%c1_42, %c0_43, %c0_44] : memref<3x64x64xf32, #tpu.memory_space<vmem>>, vector<1x64x64xf32>
    %48 = vector.shape_cast %47 : vector<1x64x64xf32> to vector<64x64xf32>
    %cst_45 = arith.constant dense<0.000000e+00> : vector<48x64xf32>
    %49 = tpu.matmul %46, %48, %cst_45 {dimension_numbers = #tpu.dot_dimension_numbers<[1], [0], [0], [1], [0, 0, 1, 1], [], []>} : vector<48x64xf32>, vector<64x64xf32>, vector<48x64xf32> -> vector<48x64xf32>
    %50 = arith.addf %45, %49 : vector<48x64xf32>
    %51 = vector.extract_strided_slice %38 {offsets = [96, 0], sizes = [48, 64], strides = [1, 1]} : vector<144x64xf32> to vector<48x64xf32>
    %c2_46 = arith.constant 2 : index
    %c0_47 = arith.constant 0 : index
    %c0_48 = arith.constant 0 : index
    %52 = vector.load %arg7[%c2_46, %c0_47, %c0_48] : memref<3x64x64xf32, #tpu.memory_space<vmem>>, vector<1x64x64xf32>
    %53 = vector.shape_cast %52 : vector<1x64x64xf32> to vector<64x64xf32>
    %cst_49 = arith.constant dense<0.000000e+00> : vector<48x64xf32>
    %54 = tpu.matmul %51, %53, %cst_49 {dimension_numbers = #tpu.dot_dimension_numbers<[1], [0], [0], [1], [0, 0, 1, 1], [], []>} : vector<48x64xf32>, vector<64x64xf32>, vector<48x64xf32> -> vector<48x64xf32>
    %55 = arith.addf %50, %54 : vector<48x64xf32>
    %c0_50 = arith.constant 0 : index
    %c0_51 = arith.constant 0 : index
    %c0_52 = arith.constant 0 : index
    %56 = vector.load %arg8[%c0_50, %c0_51, %c0_52] : memref<2x64x32xf32, #tpu.memory_space<vmem>>, vector<1x64x32xf32>
    %57 = vector.shape_cast %56 : vector<1x64x32xf32> to vector<64x32xf32>
    %cst_53 = arith.constant dense<0.000000e+00> : vector<48x32xf32>
    %58 = tpu.matmul %55, %57, %cst_53 {dimension_numbers = #tpu.dot_dimension_numbers<[1], [0], [0], [1], [0, 0, 1, 1], [], []>} : vector<48x64xf32>, vector<64x32xf32>, vector<48x32xf32> -> vector<48x32xf32>
    %c1_54 = arith.constant 1 : index
    %c0_55 = arith.constant 0 : index
    %c0_56 = arith.constant 0 : index
    %59 = vector.load %arg8[%c1_54, %c0_55, %c0_56] : memref<2x64x32xf32, #tpu.memory_space<vmem>>, vector<1x64x32xf32>
    %60 = vector.shape_cast %59 : vector<1x64x32xf32> to vector<64x32xf32>
    %cst_57 = arith.constant dense<0.000000e+00> : vector<48x32xf32>
    %61 = tpu.matmul %55, %60, %cst_57 {dimension_numbers = #tpu.dot_dimension_numbers<[1], [0], [0], [1], [0, 0, 1, 1], [], []>} : vector<48x64xf32>, vector<64x32xf32>, vector<48x32xf32> -> vector<48x32xf32>
    %62 = arith.maximumf %58, %61 : vector<48x32xf32>
    %c0_58 = arith.constant 0 : index
    %c0_59 = arith.constant 0 : index
    %c0_60 = arith.constant 0 : index
    %63 = vector.load %arg9[%c0_58, %c0_59, %c0_60] : memref<2x24x48xf32, #tpu.memory_space<vmem>>, vector<1x24x48xf32>
    %64 = vector.shape_cast %63 : vector<1x24x48xf32> to vector<24x48xf32>
    %cst_61 = arith.constant dense<0.000000e+00> : vector<24x32xf32>
    %65 = tpu.matmul %64, %62, %cst_61 {dimension_numbers = #tpu.dot_dimension_numbers<[1], [0], [0], [1], [0, 0, 1, 1], [], []>} : vector<24x48xf32>, vector<48x32xf32>, vector<24x32xf32> -> vector<24x32xf32>
    %c1_62 = arith.constant 1 : index
    %c0_63 = arith.constant 0 : index
    %c0_64 = arith.constant 0 : index
    %66 = vector.load %arg9[%c1_62, %c0_63, %c0_64] : memref<2x24x48xf32, #tpu.memory_space<vmem>>, vector<1x24x48xf32>
    %67 = vector.shape_cast %66 : vector<1x24x48xf32> to vector<24x48xf32>
    %cst_65 = arith.constant dense<0.000000e+00> : vector<24x32xf32>
    %68 = tpu.matmul %67, %62, %cst_65 {dimension_numbers = #tpu.dot_dimension_numbers<[1], [0], [0], [1], [0, 0, 1, 1], [], []>} : vector<24x48xf32>, vector<48x32xf32>, vector<24x32xf32> -> vector<24x32xf32>
    %69 = arith.maximumf %65, %68 : vector<24x32xf32>
    %cst_66 = arith.constant 0.000000e+00 : f32
    %70 = vector.broadcast %cst_66 : f32 to vector<24x32xf32>
    %71 = arith.maximumf %69, %70 : vector<24x32xf32>
    %c0_67 = arith.constant 0 : index
    %c0_68 = arith.constant 0 : index
    %72 = vector.load %arg11[%c0_67, %c0_68] : memref<96x24xf32, #tpu.memory_space<vmem>>, vector<96x24xf32>
    %cst_69 = arith.constant dense<0.000000e+00> : vector<96x32xf32>
    %73 = tpu.matmul %72, %71, %cst_69 {dimension_numbers = #tpu.dot_dimension_numbers<[1], [0], [0], [1], [0, 0, 1, 1], [], []>} : vector<96x24xf32>, vector<24x32xf32>, vector<96x32xf32> -> vector<96x32xf32>
    %c0_70 = arith.constant 0 : index
    %c0_71 = arith.constant 0 : index
    %74 = vector.load %arg13[%c0_70, %c0_71] : memref<24x1xf32, #tpu.memory_space<vmem>>, vector<24x1xf32>
    %75 = vector.extract_strided_slice %73 {offsets = [0, 0], sizes = [24, 32], strides = [1, 1]} : vector<96x32xf32> to vector<24x32xf32>
    %c0_72 = arith.constant 0 : index
    %c0_73 = arith.constant 0 : index
    %c0_74 = arith.constant 0 : index
    %76 = vector.load %arg12[%c0_72, %c0_73, %c0_74] : memref<4x32x64xf32, #tpu.memory_space<vmem>>, vector<1x32x64xf32>
    %77 = vector.shape_cast %76 : vector<1x32x64xf32> to vector<32x64xf32>
    %cst_75 = arith.constant dense<0.000000e+00> : vector<24x64xf32>
    %78 = tpu.matmul %75, %77, %cst_75 {dimension_numbers = #tpu.dot_dimension_numbers<[1], [0], [0], [1], [0, 0, 1, 1], [], []>} : vector<24x32xf32>, vector<32x64xf32>, vector<24x64xf32> -> vector<24x64xf32>
    %79 = vector.broadcast %74 : vector<24x1xf32> to vector<24x64xf32>
    %80 = arith.addf %79, %78 : vector<24x64xf32>
    %81 = vector.extract_strided_slice %73 {offsets = [24, 0], sizes = [24, 32], strides = [1, 1]} : vector<96x32xf32> to vector<24x32xf32>
    %c1_76 = arith.constant 1 : index
    %c0_77 = arith.constant 0 : index
    %c0_78 = arith.constant 0 : index
    %82 = vector.load %arg12[%c1_76, %c0_77, %c0_78] : memref<4x32x64xf32, #tpu.memory_space<vmem>>, vector<1x32x64xf32>
    %83 = vector.shape_cast %82 : vector<1x32x64xf32> to vector<32x64xf32>
    %cst_79 = arith.constant dense<0.000000e+00> : vector<24x64xf32>
    %84 = tpu.matmul %81, %83, %cst_79 {dimension_numbers = #tpu.dot_dimension_numbers<[1], [0], [0], [1], [0, 0, 1, 1], [], []>} : vector<24x32xf32>, vector<32x64xf32>, vector<24x64xf32> -> vector<24x64xf32>
    %85 = arith.addf %80, %84 : vector<24x64xf32>
    %86 = vector.extract_strided_slice %73 {offsets = [48, 0], sizes = [24, 32], strides = [1, 1]} : vector<96x32xf32> to vector<24x32xf32>
    %c2_80 = arith.constant 2 : index
    %c0_81 = arith.constant 0 : index
    %c0_82 = arith.constant 0 : index
    %87 = vector.load %arg12[%c2_80, %c0_81, %c0_82] : memref<4x32x64xf32, #tpu.memory_space<vmem>>, vector<1x32x64xf32>
    %88 = vector.shape_cast %87 : vector<1x32x64xf32> to vector<32x64xf32>
    %cst_83 = arith.constant dense<0.000000e+00> : vector<24x64xf32>
    %89 = tpu.matmul %86, %88, %cst_83 {dimension_numbers = #tpu.dot_dimension_numbers<[1], [0], [0], [1], [0, 0, 1, 1], [], []>} : vector<24x32xf32>, vector<32x64xf32>, vector<24x64xf32> -> vector<24x64xf32>
    %90 = arith.addf %85, %89 : vector<24x64xf32>
    %91 = vector.extract_strided_slice %73 {offsets = [72, 0], sizes = [24, 32], strides = [1, 1]} : vector<96x32xf32> to vector<24x32xf32>
    %c3 = arith.constant 3 : index
    %c0_84 = arith.constant 0 : index
    %c0_85 = arith.constant 0 : index
    %92 = vector.load %arg12[%c3, %c0_84, %c0_85] : memref<4x32x64xf32, #tpu.memory_space<vmem>>, vector<1x32x64xf32>
    %93 = vector.shape_cast %92 : vector<1x32x64xf32> to vector<32x64xf32>
    %cst_86 = arith.constant dense<0.000000e+00> : vector<24x64xf32>
    %94 = tpu.matmul %91, %93, %cst_86 {dimension_numbers = #tpu.dot_dimension_numbers<[1], [0], [0], [1], [0, 0, 1, 1], [], []>} : vector<24x32xf32>, vector<32x64xf32>, vector<24x64xf32> -> vector<24x64xf32>
    %95 = arith.addf %90, %94 : vector<24x64xf32>
    %cst_87 = arith.constant 0.000000e+00 : f32
    %96 = vector.broadcast %cst_87 : f32 to vector<24x64xf32>
    %97 = arith.maximumf %95, %96 : vector<24x64xf32>
    %c0_88 = arith.constant 0 : index
    %c0_89 = arith.constant 0 : index
    %98 = vector.load %arg14[%c0_88, %c0_89] : memref<64x24xf32, #tpu.memory_space<vmem>>, vector<64x24xf32>
    %cst_90 = arith.constant dense<0.000000e+00> : vector<64x64xf32>
    %99 = tpu.matmul %98, %97, %cst_90 {dimension_numbers = #tpu.dot_dimension_numbers<[1], [0], [0], [1], [0, 0, 1, 1], [], []>} : vector<64x24xf32>, vector<24x64xf32>, vector<64x64xf32> -> vector<64x64xf32>
    %c0_91 = arith.constant 0 : index
    %c0_92 = arith.constant 0 : index
    %100 = vector.load %arg16[%c0_91, %c0_92] : memref<16x1xf32, #tpu.memory_space<vmem>>, vector<16x1xf32>
    %101 = vector.extract_strided_slice %99 {offsets = [0, 0], sizes = [16, 64], strides = [1, 1]} : vector<64x64xf32> to vector<16x64xf32>
    %c0_93 = arith.constant 0 : index
    %c0_94 = arith.constant 0 : index
    %c0_95 = arith.constant 0 : index
    %102 = vector.load %arg15[%c0_93, %c0_94, %c0_95] : memref<4x64x128xf32, #tpu.memory_space<vmem>>, vector<1x64x128xf32>
    %103 = vector.shape_cast %102 : vector<1x64x128xf32> to vector<64x128xf32>
    %cst_96 = arith.constant dense<0.000000e+00> : vector<16x128xf32>
    %104 = tpu.matmul %101, %103, %cst_96 {dimension_numbers = #tpu.dot_dimension_numbers<[1], [0], [0], [1], [0, 0, 1, 1], [], []>} : vector<16x64xf32>, vector<64x128xf32>, vector<16x128xf32> -> vector<16x128xf32>
    %105 = vector.broadcast %100 : vector<16x1xf32> to vector<16x128xf32>
    %106 = arith.addf %105, %104 : vector<16x128xf32>
    %107 = vector.extract_strided_slice %99 {offsets = [16, 0], sizes = [16, 64], strides = [1, 1]} : vector<64x64xf32> to vector<16x64xf32>
    %c1_97 = arith.constant 1 : index
    %c0_98 = arith.constant 0 : index
    %c0_99 = arith.constant 0 : index
    %108 = vector.load %arg15[%c1_97, %c0_98, %c0_99] : memref<4x64x128xf32, #tpu.memory_space<vmem>>, vector<1x64x128xf32>
    %109 = vector.shape_cast %108 : vector<1x64x128xf32> to vector<64x128xf32>
    %cst_100 = arith.constant dense<0.000000e+00> : vector<16x128xf32>
    %110 = tpu.matmul %107, %109, %cst_100 {dimension_numbers = #tpu.dot_dimension_numbers<[1], [0], [0], [1], [0, 0, 1, 1], [], []>} : vector<16x64xf32>, vector<64x128xf32>, vector<16x128xf32> -> vector<16x128xf32>
    %111 = arith.addf %106, %110 : vector<16x128xf32>
    %112 = vector.extract_strided_slice %99 {offsets = [32, 0], sizes = [16, 64], strides = [1, 1]} : vector<64x64xf32> to vector<16x64xf32>
    %c2_101 = arith.constant 2 : index
    %c0_102 = arith.constant 0 : index
    %c0_103 = arith.constant 0 : index
    %113 = vector.load %arg15[%c2_101, %c0_102, %c0_103] : memref<4x64x128xf32, #tpu.memory_space<vmem>>, vector<1x64x128xf32>
    %114 = vector.shape_cast %113 : vector<1x64x128xf32> to vector<64x128xf32>
    %cst_104 = arith.constant dense<0.000000e+00> : vector<16x128xf32>
    %115 = tpu.matmul %112, %114, %cst_104 {dimension_numbers = #tpu.dot_dimension_numbers<[1], [0], [0], [1], [0, 0, 1, 1], [], []>} : vector<16x64xf32>, vector<64x128xf32>, vector<16x128xf32> -> vector<16x128xf32>
    %116 = arith.addf %111, %115 : vector<16x128xf32>
    %117 = vector.extract_strided_slice %99 {offsets = [48, 0], sizes = [16, 64], strides = [1, 1]} : vector<64x64xf32> to vector<16x64xf32>
    %c3_105 = arith.constant 3 : index
    %c0_106 = arith.constant 0 : index
    %c0_107 = arith.constant 0 : index
    %118 = vector.load %arg15[%c3_105, %c0_106, %c0_107] : memref<4x64x128xf32, #tpu.memory_space<vmem>>, vector<1x64x128xf32>
    %119 = vector.shape_cast %118 : vector<1x64x128xf32> to vector<64x128xf32>
    %cst_108 = arith.constant dense<0.000000e+00> : vector<16x128xf32>
    %120 = tpu.matmul %117, %119, %cst_108 {dimension_numbers = #tpu.dot_dimension_numbers<[1], [0], [0], [1], [0, 0, 1, 1], [], []>} : vector<16x64xf32>, vector<64x128xf32>, vector<16x128xf32> -> vector<16x128xf32>
    %121 = arith.addf %116, %120 : vector<16x128xf32>
    %c0_109 = arith.constant 0 : index
    %c0_110 = arith.constant 0 : index
    %c0_111 = arith.constant 0 : index
    %122 = vector.load %arg18[%c0_109, %c0_110, %c0_111] : memref<1x16x128xf32, #tpu.memory_space<vmem>>, vector<1x16x128xf32>
    %123 = vector.shape_cast %122 : vector<1x16x128xf32> to vector<16x128xf32>
    %124 = vector.shape_cast %121 : vector<16x128xf32> to vector<1x16x128xf32>
    tpu.vector_store %arg18[%c0_109, %c0_110, %c0_111], %124 {strides = array<i32>} : memref<1x16x128xf32, #tpu.memory_space<vmem>>, vector<1x16x128xf32>,
    return
  }
  func.func @transform_0(%arg0: i32) -> (i32, i32) {
    %c0_i32 = arith.constant 0 : i32
    %c0_i32_0 = arith.constant 0 : i32
    %c0_i32_1 = arith.constant 0 : i32
    return %c0_i32, %c0_i32_0 : i32, i32
  }
  func.func @transform_1(%arg0: i32) -> (i32, i32, i32) {
    %c0_i32 = arith.constant 0 : i32
    %c0_i32_0 = arith.constant 0 : i32
    %c0_i32_1 = arith.constant 0 : i32
    %c0_i32_2 = arith.constant 0 : i32
    return %c0_i32, %c0_i32_0, %c0_i32_1 : i32, i32, i32
  }
  func.func @transform_2(%arg0: i32) -> (i32, i32, i32) {
    %c0_i32 = arith.constant 0 : i32
    %c0_i32_0 = arith.constant 0 : i32
    %c0_i32_1 = arith.constant 0 : i32
    %c0_i32_2 = arith.constant 0 : i32
    return %c0_i32, %c0_i32_0, %c0_i32_1 : i32, i32, i32
  }
  func.func @transform_3(%arg0: i32) -> (i32, i32, i32) {
    %c0_i32 = arith.constant 0 : i32
    %c0_i32_0 = arith.constant 0 : i32
    %c0_i32_1 = arith.constant 0 : i32
    %c0_i32_2 = arith.constant 0 : i32
    return %c0_i32, %c0_i32_0, %c0_i32_1 : i32, i32, i32
  }
  func.func @transform_4(%arg0: i32) -> (i32, i32) {
    %c0_i32 = arith.constant 0 : i32
    %c0_i32_0 = arith.constant 0 : i32
    %c0_i32_1 = arith.constant 0 : i32
    return %c0_i32, %c0_i32_0 : i32, i32
  }
  func.func @transform_5(%arg0: i32) -> (i32, i32) {
    %c0_i32 = arith.constant 0 : i32
    %c0_i32_0 = arith.constant 0 : i32
    %c0_i32_1 = arith.constant 0 : i32
    return %c0_i32, %c0_i32_0 : i32, i32
  }
  func.func @transform_6(%arg0: i32) -> (i32, i32, i32) {
    %c0_i32 = arith.constant 0 : i32
    %c0_i32_0 = arith.constant 0 : i32
    %c0_i32_1 = arith.constant 0 : i32
    %c0_i32_2 = arith.constant 0 : i32
    return %c0_i32, %c0_i32_0, %c0_i32_1 : i32, i32, i32
  }
  func.func @transform_7(%arg0: i32) -> (i32, i32, i32) {
    %c0_i32 = arith.constant 0 : i32
    %c0_i32_0 = arith.constant 0 : i32
    %c0_i32_1 = arith.constant 0 : i32
    %c0_i32_2 = arith.constant 0 : i32
    return %c0_i32, %c0_i32_0, %c0_i32_1 : i32, i32, i32
  }
  func.func @transform_8(%arg0: i32) -> (i32, i32, i32) {
    %c0_i32 = arith.constant 0 : i32
    %c0_i32_0 = arith.constant 0 : i32
    %c0_i32_1 = arith.constant 0 : i32
    %c0_i32_2 = arith.constant 0 : i32
    return %c0_i32, %c0_i32_0, %c0_i32_1 : i32, i32, i32
  }
  func.func @transform_9(%arg0: i32) -> (i32, i32) {
    %c0_i32 = arith.constant 0 : i32
    %c0_i32_0 = arith.constant 0 : i32
    %c0_i32_1 = arith.constant 0 : i32
    return %c0_i32, %c0_i32_0 : i32, i32
  }
  func.func @transform_10(%arg0: i32) -> (i32, i32) {
    %c0_i32 = arith.constant 0 : i32
    %c0_i32_0 = arith.constant 0 : i32
    %c0_i32_1 = arith.constant 0 : i32
    return %c0_i32, %c0_i32_0 : i32, i32
  }
  func.func @transform_11(%arg0: i32) -> (i32, i32, i32) {
    %c0_i32 = arith.constant 0 : i32
    %c0_i32_0 = arith.constant 0 : i32
    %c0_i32_1 = arith.constant 0 : i32
    %c0_i32_2 = arith.constant 0 : i32
    return %c0_i32, %c0_i32_0, %c0_i32_1 : i32, i32, i32
  }
  func.func @transform_12(%arg0: i32) -> (i32, i32) {
    %c0_i32 = arith.constant 0 : i32
    %c0_i32_0 = arith.constant 0 : i32
    %c0_i32_1 = arith.constant 0 : i32
    return %c0_i32, %c0_i32_0 : i32, i32
  }
  func.func @transform_13(%arg0: i32) -> (i32, i32) {
    %c0_i32 = arith.constant 0 : i32
    %c0_i32_0 = arith.constant 0 : i32
    %c0_i32_1 = arith.constant 0 : i32
    return %c0_i32, %c0_i32_0 : i32, i32
  }
  func.func @transform_14(%arg0: i32) -> (i32, i32, i32) {
    %c0_i32 = arith.constant 0 : i32
    %c0_i32_0 = arith.constant 0 : i32
    %c0_i32_1 = arith.constant 0 : i32
    %c0_i32_2 = arith.constant 0 : i32
    return %c0_i32, %c0_i32_0, %c0_i32_1 : i32, i32, i32
  }
  func.func @transform_15(%arg0: i32) -> (i32, i32) {
    %c0_i32 = arith.constant 0 : i32
    %c0_i32_0 = arith.constant 0 : i32
    %c0_i32_1 = arith.constant 0 : i32
    return %c0_i32, %c0_i32_0 : i32, i32
  }
  func.func @transform_16(%arg0: i32) -> (i32, i32, i32) {
    %c0_i32 = arith.constant 0 : i32
    %c0_i32_0 = arith.constant 0 : i32
    %c0_i32_1 = arith.constant 0 : i32
    return %arg0, %c0_i32, %c0_i32_0 : i32, i32, i32
  }
  func.func @transform_17(%arg0: i32) -> (i32, i32, i32) {
    %c0_i32 = arith.constant 0 : i32
    %c0_i32_0 = arith.constant 0 : i32
    %c0_i32_1 = arith.constant 0 : i32
    return %arg0, %c0_i32, %c0_i32_0 : i32, i32, i32
  }
}

</mosaic_0001>

<bundles_post_ra>
// kernel: my_model.1
= control target key start
LH: loop header
LB: loop body
LE: loop exit
PB: predicated region body
PF: predicated region fallthrough
CT: control target
= control target key end

     0   :  { %s5188_s24 = smov 0   ;;  %s6181_s0 = inlined_call_operand.vmem [shape: f32[144,16], index: 0, kind: input, shape index: {}]   ;;  %s6182_s1 = inlined_call_operand.vmem [shape: f32[3,128,128], index: 1, kind: input, shape index: {}]   ;;  %s6183_s2 = inlined_call_operand.vmem [shape: f32[2,128,64], index: 2, kind: input, shape index: {}]   ;;  %s6184_s3 = inlined_call_operand.vmem [shape: f32[2,24,48], index: 3, kind: input, shape index: {}]   ;;  %s6185_s4 = inlined_call_operand.vmem [shape: f32[48,1], index: 4, kind: input, shape index: {}]   ;;  %s6186_s5 = inlined_call_operand.vmem [shape: f32[144,24], index: 5, kind: input, shape index: {}]   ;;  %s6187_s6 = inlined_call_operand.vmem [shape: f32[3,64,64], index: 6, kind: input, shape index: {}]   ;;  %s6188_s7 = inlined_call_operand.vmem [shape: f32[2,64,32], index: 7, kind: input, shape index: {}]   ;;  %s6189_s8 = inlined_call_operand.vmem [shape: f32[2,24,48], index: 8, kind: input, shape index: {}]   ;;  %s6190_s9 = inlined_call_operand.vmem [shape: f32[48,1], index: 9, kind: input, shape index: {}]   ;;  %s6191_s10 = inlined_call_operand.vmem [shape: f32[96,24], index: 10, kind: input, shape index: {}]   ;;  %s6192_s11 = inlined_call_operand.vmem [shape: f32[4,32,64], index: 11, kind: input, shape index: {}]   ;;  %s6193_s12 = inlined_call_operand.vmem [shape: f32[24,1], index: 12, kind: input, shape index: {}]   ;;  %s6194_s13 = inlined_call_operand.vmem [shape: f32[64,24], index: 13, kind: input, shape index: {}]   ;;  %s6195_s14 = inlined_call_operand.vmem [shape: f32[4,64,128], index: 14, kind: input, shape index: {}]   ;;  %s6196_s15 = inlined_call_operand.vmem [shape: f32[16,1], index: 15, kind: input, shape index: {}]   ;;  %s6197_s16 = inlined_call_operand.vmem [shape: f32[2,16,128], index: 16, kind: input, shape index: {}]   ;;  %s6198_s17 = inlined_call_operand.vmem [shape: f32[2,16,128], index: 17, kind: output, shape index: {}]  }
   0x1   :  { %6201 = sst [smem:[#allocation2_spill]] %s6181_s0 }
   0x2   :  { %6202 = sst [smem:[#allocation3_spill]] %s6182_s1 }
   0x3 LB: > { %s3814_s25 = sadd.s32 4294967295, %s5093_s24   ;;  %p3818_p0 = scmp.ge.s32.totalorder %s5093_s24, 1  ;;  %s5093_s24 = sphi %s5188_s24, %s27_s24  }
   0x4   : > { %p487_p1 = scmp.lt.s32.totalorder %s5093_s24, 3 }
   0x6   : > { %p488_p2 = pnand %p3818_p0, %p487_p1 }
   0x7   : > { %p539_p3 = scmp.lt.s32.totalorder (!%p488_p2), %s3814_s25, 1  ;;  %s6203_s28 = sld [smem:[#allocation2_spill]] (!%p488_p2) }
   0x8   : > { %491 = sbr.rel (%p488_p2) target bundleno = 2584 (0xa18), region = 88  ;;  %s6204_s20 = sld [smem:[#allocation3_spill]] (!%p488_p2) }
   0xd   : > { %v551_v0 = vld [vmem:[%s6203_s28] sm:$0xff]  ;;  %vm569_vm0 = vcmask 130048   ;;  %s6206_s25 = smov (!%p539_p3, %s3814_s25), 1  ;;  %v552_v5 = vld [vmem:[%s6203_s28 + $0x8] sm:$0xff]  ;;  %v553_v7 = vld [vmem:[%s6203_s28 + $0x10] sm:$0xff]  ;;  %v5095_v55 = vmov 0  }
   0xe   : > { %4414 = vmatprep.mubr.msk.f32.mxu0 %vm569_vm0, %v551_v0  ;;  %s4057_s29 = sshll.u32 %s6206_s25, 4  ;;  %v800_v3 = vld [vmem:[%s6204_s20 + $0x78] sm:$0xff]  ;;  %v799_v4 = vld [vmem:[%s6204_s20 + $0x70] sm:$0xff]  ;;  %v798_v6 = vld [vmem:[%s6204_s20 + $0x68] sm:$0xff]  ;;  %5085 = vset.pattern.permute.xlu0 %v5095_v55  ;;  %vm5097_vm1 = vmmov 0   ;;  %vm1400_vm2 = vcmask 392192  }
   0xf   : > { %s543_s18 = scalar_lea.vmem %s6197_s16, %s4057_s29  ;;  %4441 = vmatprep.subr.mxu1 %v800_v3  ;;  %v797_v8 = vld [vmem:[%s6204_s20 + $0x60] sm:$0xff]  ;;  %v3856_v9 = vld [vmem:[%s6204_s20 + $0xf8] sm:$0xff]  ;;  %v795_v13 = vld [vmem:[%s6204_s20 + $0x50] sm:$0xff]  ;;  %5086 = vset.pattern.permute.xlu1 %v5095_v55  ;;  %vm1607_vm3 = vcmask 195584   ;;  %vm1831_vm4 = vcmask 523264   ;;  %vm2839_vm5 = vcmask 261120   ;;  %s548_s27 = scalar_lea.vmem %s6198_s17, %s4057_s29 }
  0x10   : > { %v550_v1 = vld [vmem:[%s543_s18 + $0x8] sm:$0xff]  ;;  %v549_v2 = vld [vmem:[%s543_s18] sm:$0xff]  ;;  %4442 = vmatpush3.msra.mxu1 %v800_v3  ;;  %v554_v10 = vld [vmem:[%s6203_s28 + $0x18] sm:$0xff] }
  0x11   : > { %4410 = vmatprep.subr.mxu0 %v550_v1  ;;  %4443 = vmatprep.subr.mxu1 %v799_v4  ;;  %v796_v11 = vld [vmem:[%s6204_s20 + $0x58] sm:$0xff]  ;;  %v555_v12 = vld [vmem:[%s6203_s28 + $0x20] sm:$0xff]  ;;  %v3855_v14 = vld [vmem:[%s6204_s20 + $0xf0] sm:$0xff] }
  0x12   : > { %4411 = vmatpush3.msra.mxu0 %v550_v1  ;;  %4444 = vmatpush3.msra.mxu1 %v799_v4  ;;  %v556_v15 = vld [vmem:[%s6203_s28 + $0x28] sm:$0xff]  ;;  %v557_v17 = vld [vmem:[%s6203_s28 + $0x30] sm:$0xff]  ;;  %v793_v18 = vld [vmem:[%s6204_s20 + $0x40] sm:$0xff] }
  0x13   : > { %4412 = vmatprep.subr.mxu0 %v549_v2  ;;  %4445 = vmatprep.subr.mxu1 %v798_v6  ;;  %v794_v16 = vld [vmem:[%s6204_s20 + $0x48] sm:$0xff]  ;;  %v558_v20 = vld [vmem:[%s6203_s28 + $0x38] sm:$0xff]  ;;  %v559_v22 = vld [vmem:[%s6203_s28 + $0x40] sm:$0xff] }
  0x14   : > { %4413 = vmatpush3.msra.mxu0 %v549_v2  ;;  %4446 = vmatpush3.msra.mxu1 %v798_v6  ;;  %v3854_v19 = vld [vmem:[%s6204_s20 + $0xe8] sm:$0xff]  ;;  %v792_v21 = vld [vmem:[%s6204_s20 + $0x38] sm:$0xff]  ;;  %v791_v23 = vld [vmem:[%s6204_s20 + $0x30] sm:$0xff] }
  0x15   : > { %4415 = vmatmul.mubr.msk.f32.vlgmr.msra.gmra.mxu0 %vm569_vm0, %v552_v5  ;;  %4447 = vmatprep.subr.mxu1 %v797_v8  ;;  %v3853_v24 = vld [vmem:[%s6204_s20 + $0xe0] sm:$0xff]  ;;  %v560_v25 = vld [vmem:[%s6203_s28 + $0x48] sm:$0xff]  ;;  %v561_v27 = vld [vmem:[%s6203_s28 + $0x50] sm:$0xff] }
  0x16   : > { %4417 = vmatprep.mubr.msk.f32.mxu0 %vm569_vm0, %v553_v7  ;;  %4482 = vmatprep.subr.mxu0 %v3856_v9  ;;  %v790_v26 = vld [vmem:[%s6204_s20 + $0x28] sm:$0xff]  ;;  %v3852_v28 = vld [vmem:[%s6204_s20 + $0xd8] sm:$0xff]  ;;  %v789_v29 = vld [vmem:[%s6204_s20 + $0x20] sm:$0xff] }
  0x17   : > { %4448 = vmatpush3.msra.mxu1 %v797_v8  ;;  %4483 = vmatpush3.msra.mxu0 %v3856_v9  ;;  %v562_v30 = vld [vmem:[%s6203_s28 + $0x58] sm:$0xff]  ;;  %v3851_v31 = vld [vmem:[%s6204_s20 + $0xd0] sm:$0xff]  ;;  %v563_v32 = vld [vmem:[%s6203_s28 + $0x60] sm:$0xff] }
  0x18   : > { %4449 = vmatprep.subr.mxu1 %v796_v11  ;;  %4484 = vmatprep.subr.mxu0 %v3855_v14  ;;  %v788_v33 = vld [vmem:[%s6204_s20 + $0x18] sm:$0xff]  ;;  %v3850_v34 = vld [vmem:[%s6204_s20 + $0xc8] sm:$0xff]  ;;  %v787_v35 = vld [vmem:[%s6204_s20 + $0x10] sm:$0xff] }
  0x19   : > { %4418 = vmatmul.mubr.msk.f32.gmra.mxu0 %vm569_vm0, %v554_v10  ;;  %4450 = vmatpush3.msra.mxu1 %v796_v11  ;;  %v564_v36 = vld [vmem:[%s6203_s28 + $0x68] sm:$0xff]  ;;  %v565_v37 = vld [vmem:[%s6203_s28 + $0x70] sm:$0xff]  ;;  %v3849_v38 = vld [vmem:[%s6204_s20 + $0xc0] sm:$0xff] }
  0x1a   : > { %4420 = vmatprep.mubr.msk.f32.mxu0 %vm569_vm0, %v555_v12  ;;  %4451 = vmatprep.subr.mxu1 %v795_v13  ;;  %v786_v39 = vld [vmem:[%s6204_s20 + $0x8] sm:$0xff]  ;;  %v566_v40 = vld [vmem:[%s6203_s28 + $0x78] sm:$0xff]  ;;  %v567_v41 = vld [vmem:[%s6203_s28 + $0x80] sm:$0xff] }
  0x1b   : > { %4452 = vmatpush3.msra.mxu1 %v795_v13  ;;  %4485 = vmatpush3.msra.mxu0 %v3855_v14  ;;  %v568_v42 = vld [vmem:[%s6203_s28 + $0x88] sm:$0xff]  ;;  %v3848_v43 = vld [vmem:[%s6204_s20 + $0xb8] sm:$0xff]  ;;  %v785_v44 = vld [vmem:[%s6204_s20] sm:$0xff] }
  0x1c   : > { %4453 = vmatprep.subr.mxu1 %v794_v16  ;;  %4486 = vmatprep.subr.mxu0 %v3854_v19  ;;  %v3847_v45 = vld [vmem:[%s6204_s20 + $0xb0] sm:$0xff]  ;;  %v5357_v46 = vld [vmem:[%s6204_s20 + $0x178] sm:$0xff]  ;;  %v3846_v47 = vld [vmem:[%s6204_s20 + $0xa8] sm:$0xff] }
  0x1d   : > { %4421 = vmatmul.mubr.msk.f32.gmra.mxu0 %vm569_vm0, %v556_v15  ;;  %4454 = vmatpush3.msra.mxu1 %v794_v16  ;;  %v3845_v48 = vld [vmem:[%s6204_s20 + $0xa0] sm:$0xff]  ;;  %v3844_v49 = vld [vmem:[%s6204_s20 + $0x98] sm:$0xff]  ;;  %v3843_v50 = vld [vmem:[%s6204_s20 + $0x90] sm:$0xff] }
  0x1e   : > { %4423 = vmatprep.mubr.msk.f32.mxu0 %vm569_vm0, %v557_v17  ;;  %4455 = vmatprep.subr.mxu1 %v793_v18  ;;  %v3842_v51 = vld [vmem:[%s6204_s20 + $0x88] sm:$0xff]  ;;  %v3841_v52 = vld [vmem:[%s6204_s20 + $0x80] sm:$0xff]  ;;  %v781_v54 = vld [vmem:[%s6185_s4 + $0x10] sm:$0xff] }
  0x1f   : > { %4456 = vmatpush3.msra.mxu1 %v793_v18  ;;  %4487 = vmatpush3.msra.mxu0 %v3854_v19  ;;  %v779_v53 = vld [vmem:[%s6185_s4] sm:$0xff]  ;;  %v780_v56 = vld [vmem:[%s6185_s4 + $0x8] sm:$0xff]  ;;  %v782_v57 = vld [vmem:[%s6185_s4 + $0x18] sm:$0xff] }
  0x20   : > { %4457 = vmatprep.subr.mxu1 %v792_v21  ;;  %4488 = vmatprep.subr.mxu0 %v3853_v24  ;;  %v783_v58 = vld [vmem:[%s6185_s4 + $0x20] sm:$0xff]  ;;  %v784_v59 = vld [vmem:[%s6185_s4 + $0x28] sm:$0xff]  ;;  %v1819_v62 = vld [vmem:[%s6190_s9 + $0x10] sm:$0xff] }
  0x21   : > { %4424 = vmatmul.mubr.msk.f32.gmra.mxu0 %vm569_vm0, %v558_v20  ;;  %4458 = vmatpush3.msra.mxu1 %v792_v21  ;;  %v1817_v60 = vld [vmem:[%s6190_s9] sm:$0xff]  ;;  %v1818_v61 = vld [vmem:[%s6190_s9 + $0x8] sm:$0xff]  ;;  %v1820_v63 = vld [vmem:[%s6190_s9 + $0x18] sm:$0xff] }
  0x22   : > { %4426 = vmatprep.mubr.msk.f32.mxu0 %vm569_vm0, %v559_v22  ;;  %4459 = vmatprep.subr.mxu1 %v791_v23  ;;  %v1821_v0 = vld [vmem:[%s6190_s9 + $0x20] sm:$0xff]  ;;  %v1822_v1 = vld [vmem:[%s6190_s9 + $0x28] sm:$0xff]  ;;  %v2834_v2 = vld [vmem:[%s6193_s12 + $0x10] sm:$0xff] }
  0x23   : > { %4460 = vmatpush3.msra.mxu1 %v791_v23  ;;  %4489 = vmatpush3.msra.mxu0 %v3853_v24  ;;  %v2833_v3 = vld [vmem:[%s6193_s12 + $0x8] sm:$0xff]  ;;  %v2832_v4 = vld [vmem:[%s6193_s12] sm:$0xff]  ;;  %v3871_v9 = vld [vmem:[%s6204_s20 + $0x170] sm:$0xff] }
  0x24   : > { %4461 = vmatprep.subr.mxu1 %v790_v26  ;;  %4490 = vmatprep.subr.mxu0 %v3852_v28  ;;  %v3378_v5 = vld [vmem:[%s6196_s15] sm:$0xff]  ;;  %v3379_v6 = vld [vmem:[%s6196_s15 + $0x8] sm:$0xff]  ;;  %v3868_v15 = vld [vmem:[%s6204_s20 + $0x158] sm:$0xff] }
  0x25   : > { %4427 = vmatmul.mubr.msk.f32.gmra.mxu0 %vm569_vm0, %v560_v25  ;;  %4462 = vmatpush3.msra.mxu1 %v790_v26  ;;  %v3870_v11 = vld [vmem:[%s6204_s20 + $0x168] sm:$0xff]  ;;  %v3869_v13 = vld [vmem:[%s6204_s20 + $0x160] sm:$0xff]  ;;  %v3867_v17 = vld [vmem:[%s6204_s20 + $0x150] sm:$0xff] }
  0x26   : > { %4429 = vmatprep.mubr.msk.f32.mxu0 %vm569_vm0, %v561_v27  ;;  %4463 = vmatprep.subr.mxu1 %v789_v29  ;;  %v3866_v19 = vld [vmem:[%s6204_s20 + $0x148] sm:$0xff]  ;;  %v3865_v21 = vld [vmem:[%s6204_s20 + $0x140] sm:$0xff]  ;;  %v3864_v23 = vld [vmem:[%s6204_s20 + $0x138] sm:$0xff] }
  0x27   : > { %4491 = vmatpush3.msra.mxu0 %v3852_v28  ;;  %4464 = vmatpush3.msra.mxu1 %v789_v29  ;;  %v3863_v25 = vld [vmem:[%s6204_s20 + $0x130] sm:$0xff]  ;;  %v3862_v27 = vld [vmem:[%s6204_s20 + $0x128] sm:$0xff]  ;;  %v3861_v29 = vld [vmem:[%s6204_s20 + $0x120] sm:$0xff] }
  0x28   : > { %4492 = vmatprep.subr.mxu0 %v3851_v31  ;;  %4465 = vmatprep.subr.mxu1 %v788_v33  ;;  %v3881_v55 = vld [vmem:[%s6183_s2 + $0xc0] sm:$0xff] }
  0x29   : > { %4430 = vmatmul.mubr.msk.f32.gmra.mxu0 %vm569_vm0, %v562_v30  ;;  %4466 = vmatpush3.msra.mxu1 %v788_v33  ;;  %v3859_v33 = vld [vmem:[%s6204_s20 + $0x110] sm:$0xff] }
  0x2a   : > { %4432 = vmatprep.mubr.msk.f32.mxu0 %vm569_vm0, %v563_v32  ;;  %4493 = vmatpush3.msra.mxu0 %v3851_v31  ;;  %v3860_v31 = vld [vmem:[%s6204_s20 + $0x118] sm:$0xff] }
  0x2b   : > { %4494 = vmatprep.subr.mxu0 %v3850_v34  ;;  %4467 = vmatprep.subr.mxu1 %v787_v35 }
  0x2c   : > { %4468 = vmatpush3.msra.mxu1 %v787_v35  ;;  %4495 = vmatpush3.msra.mxu0 %v3850_v34  ;;  %v3858_v35 = vld [vmem:[%s6204_s20 + $0x108] sm:$0xff] }
  0x2d   : > { %4433 = vmatmul.mubr.msk.f32.gmra.mxu0 %vm569_vm0, %v564_v36  ;;  %4496 = vmatprep.subr.mxu0 %v3849_v38 }
  0x2e   : > { %4435 = vmatprep.mubr.msk.f32.mxu0 %vm569_vm0, %v565_v37  ;;  %4469 = vmatprep.subr.mxu1 %v786_v39  ;;  %v3857_v37 = vld [vmem:[%s6204_s20 + $0x100] sm:$0xff] }
  0x2f   : > { %4497 = vmatpush3.msra.mxu0 %v3849_v38  ;;  %4470 = vmatpush3.msra.mxu1 %v786_v39 }
  0x30   : > { %4498 = vmatprep.subr.mxu0 %v3848_v43  ;;  %4471 = vmatprep.subr.mxu1 %v785_v44 }
  0x31   : > { %4436 = vmatmul.mubr.msk.f32.gmra.mxu0 %vm569_vm0, %v566_v40  ;;  %4472 = vmatpush3.msra.mxu1 %v785_v44  ;;  %v1183_v40 = vld [vmem:[%s6183_s2 + $0x78] sm:$0xff]  ;;  %v1181_v44 = vld [vmem:[%s6183_s2 + $0x68] sm:$0xff] }
  0x32   : > { %4438 = vmatprep.mubr.msk.f32.mxu0 %vm569_vm0, %v567_v41  ;;  %4499 = vmatpush3.msra.mxu0 %v3848_v43  ;;  %v3888_v41 = vld [vmem:[%s6183_s2 + $0xf8] sm:$0xff]  ;;  %v3887_v43 = vld [vmem:[%s6183_s2 + $0xf0] sm:$0xff] }
  0x33   : > { %4500 = vmatprep.subr.mxu0 %v3847_v45  ;;  %4523 = vmatprep.subr.mxu1 %v5357_v46 }
  0x34   : > { %4501 = vmatpush3.msra.mxu0 %v3847_v45  ;;  %898 = vperm.xlu0 %5085, %v779_v53   ;;  %v3886_v45 = vld [vmem:[%s6183_s2 + $0xe8] sm:$0xff] }
  0x35   : > { %4439 = vmatmul.mubr.msk.f32.gmra.mxu0 %vm569_vm0, %v568_v42  ;;  %4502 = vmatprep.subr.mxu0 %v3846_v47  ;;  %v1182_v42 = vld [vmem:[%s6183_s2 + $0x70] sm:$0xff]  ;;  %v3882_v53 = vld [vmem:[%s6183_s2 + $0xc8] sm:$0xff] }
  0x36   : > { %4503 = vmatpush3.msra.mxu0 %v3846_v47  ;;  %908 = vperm.xlu1 %5086, %v781_v54   ;;  %v3885_v47 = vld [vmem:[%s6183_s2 + $0xe0] sm:$0xff] }
  0x37   : > { %4504 = vmatprep.subr.mxu0 %v3845_v48  ;;  %v1176_v54 = vld [vmem:[%s6183_s2 + $0x40] sm:$0xff] }
  0x38   : > { %4505 = vmatpush3.msra.mxu0 %v3845_v48  ;;  %903 = vperm.xlu0 %5085, %v780_v56   ;;  %v1179_v48 = vld [vmem:[%s6183_s2 + $0x58] sm:$0xff] }
  0x39   : > { %4506 = vmatprep.subr.mxu0 %v3844_v49  ;;  %v1175_v56 = vld [vmem:[%s6183_s2 + $0x38] sm:$0xff] }
  0x3a   : > { %4507 = vmatpush3.msra.mxu0 %v3844_v49  ;;  %913 = vperm.xlu1 %5086, %v782_v57   ;;  %v3884_v49 = vld [vmem:[%s6183_s2 + $0xd8] sm:$0xff] }
  0x3b   : > { %4508 = vmatprep.subr.mxu0 %v3843_v50  ;;  %v3880_v57 = vld [vmem:[%s6183_s2 + $0xb8] sm:$0xff] }
  0x3c   : > { %4509 = vmatpush3.msra.mxu0 %v3843_v50  ;;  %918 = vperm.xlu0 %5085, %v783_v58   ;;  %v1178_v50 = vld [vmem:[%s6183_s2 + $0x50] sm:$0xff] }
  0x3d   : > { %4510 = vmatprep.subr.mxu0 %v3842_v51  ;;  %v1174_v58 = vld [vmem:[%s6183_s2 + $0x30] sm:$0xff] }
  0x3e   : > { %4511 = vmatpush3.msra.mxu0 %v3842_v51  ;;  %923 = vperm.xlu1 %5086, %v784_v59   ;;  %v3883_v51 = vld [vmem:[%s6183_s2 + $0xd0] sm:$0xff] }
  0x3f   : > { %4512 = vmatprep.subr.mxu0 %v3841_v52  ;;  %v3879_v59 = vld [vmem:[%s6183_s2 + $0xb0] sm:$0xff] }
  0x40   : > { %4513 = vmatpush3.msra.mxu0 %v3841_v52  ;;  %1947 = vperm.xlu0 %5085, %v1817_v60   ;;  %v1177_v52 = vld [vmem:[%s6183_s2 + $0x48] sm:$0xff] }
  0x41   : > { %4564 = vmatprep.subr.mxu0 %v1183_v40  ;;  %v1173_v60 = vld [vmem:[%s6183_s2 + $0x28] sm:$0xff] }
  0x42   : > { %1952 = vperm.xlu1 %5086, %v1818_v61   ;;  %v3878_v61 = vld [vmem:[%s6183_s2 + $0xa8] sm:$0xff] }
  0x44   : > { %1957 = vperm.xlu0 %5085, %v1819_v62   ;;  %v1172_v62 = vld [vmem:[%s6183_s2 + $0x20] sm:$0xff] }
  0x46   : > { %1962 = vperm.xlu1 %5086, %v1820_v63   ;;  %v3877_v63 = vld [vmem:[%s6183_s2 + $0xa0] sm:$0xff] }
  0x48   : > { %1967 = vperm.xlu0 %5085, %v1821_v0   ;;  %v1171_v0 = vld [vmem:[%s6183_s2 + $0x18] sm:$0xff] }
  0x4a   : > { %1972 = vperm.xlu1 %5086, %v1822_v1   ;;  %v3876_v1 = vld [vmem:[%s6183_s2 + $0x98] sm:$0xff] }
  0x4c   : > { %2941 = vperm.xlu0 %5085, %v2834_v2   ;;  %v1170_v2 = vld [vmem:[%s6183_s2 + $0x10] sm:$0xff] }
  0x4e   : > { %2936 = vperm.xlu1 %5086, %v2833_v3   ;;  %v3875_v3 = vld [vmem:[%s6183_s2 + $0x90] sm:$0xff] }
  0x50   : > { %2931 = vperm.xlu0 %5085, %v2832_v4   ;;  %v1169_v4 = vld [vmem:[%s6183_s2 + $0x8] sm:$0xff] }
  0x52   : > { %3471 = vperm.xlu1 %5086, %v3378_v5   ;;  %v3874_v5 = vld [vmem:[%s6183_s2 + $0x88] sm:$0xff] }
  0x54   : > { %3476 = vperm.xlu0 %5085, %v3379_v6   ;;  %v1168_v6 = vld [vmem:[%s6183_s2] sm:$0xff] }
  0xd5   : > { %v4416_v7 = vpop.f32.mrf.mxu0 }
  0xd7   : > { %v690_v8 = vpop.f32.mrf.mxu0 }
  0xd8   : > { %4473 = vmatprep.mubr.f32.mxu1 %v690_v8 }
  0xd9   : > { %v4419_v10 = vpop.f32.mrf.mxu0  ;;  %4474 = vmatmul.mubr.f32.vlgmr.msra.gmra.mxu1 %v4416_v7  ;;  %v3873_v7 = vld [vmem:[%s6183_s2 + $0x80] sm:$0xff] }
  0xda   : > { %4524 = vmatpush3.msra.mxu1 %v5357_v46  ;;  %v1180_v46 = vld [vmem:[%s6183_s2 + $0x60] sm:$0xff] }
  0xdb   : > { %4525 = vmatprep.subr.mxu1 %v3871_v9  ;;  %v700_v12 = vpop.f32.mrf.mxu0 }
  0xdc   : > { %4526 = vmatpush3.msra.mxu1 %v3871_v9  ;;  %4476 = vmatprep.mubr.f32.mxu1 %v700_v12 }
  0xdd   : > { %4527 = vmatprep.subr.mxu1 %v3870_v11  ;;  %v4422_v14 = vpop.f32.mrf.mxu0  ;;  %4477 = vmatmul.mubr.f32.gmra.mxu1 %v4419_v10 }
  0xde   : > { %4528 = vmatpush3.msra.mxu1 %v3870_v11 }
  0xdf   : > { %4529 = vmatprep.subr.mxu1 %v3869_v13  ;;  %v710_v16 = vpop.f32.mrf.mxu0 }
  0xe0   : > { %4530 = vmatpush3.msra.mxu1 %v3869_v13  ;;  %4479 = vmatprep.mubr.f32.mxu1 %v710_v16 }
  0xe1   : > { %4531 = vmatprep.subr.mxu1 %v3868_v15  ;;  %v4425_v18 = vpop.f32.mrf.mxu0  ;;  %4480 = vmatmul.mubr.f32.gmra.mxu1 %v4422_v14  ;;  %v899_v14 = vpop.permute.xlu0 %898 }
  0xe2   : > { %4532 = vmatpush3.msra.mxu1 %v3868_v15 }
  0xe3   : > { %4533 = vmatprep.subr.mxu1 %v3867_v17  ;;  %v720_v20 = vpop.f32.mrf.mxu0 }
  0xe4   : > { %4534 = vmatpush3.msra.mxu1 %v3867_v17  ;;  %4514 = vmatprep.mubr.f32.mxu0 %v720_v20  ;;  %v909_v17 = vpop.permute.xlu1 %908 }
  0xe5   : > { %4535 = vmatprep.subr.mxu1 %v3866_v19  ;;  %v4428_v22 = vpop.f32.mrf.mxu0  ;;  %4515 = vmatmul.mubr.f32.vlgmr.msra.gmra.mxu0 %v4425_v18  ;;  %v904_v20 = vpop.permute.xlu0 %903 }
  0xe6   : > { %4536 = vmatpush3.msra.mxu1 %v3866_v19  ;;  %4565 = vmatpush3.msra.mxu0 %v1183_v40 }
  0xe7   : > { %4537 = vmatprep.subr.mxu1 %v3865_v21  ;;  %v730_v24 = vpop.f32.mrf.mxu0  ;;  %4566 = vmatprep.subr.mxu0 %v1182_v42 }
  0xe8   : > { %4538 = vmatpush3.msra.mxu1 %v3865_v21  ;;  %4517 = vmatprep.mubr.f32.mxu0 %v730_v24  ;;  %v914_v24 = vpop.permute.xlu1 %913 }
  0xe9   : > { %4539 = vmatprep.subr.mxu1 %v3864_v23  ;;  %v4431_v26 = vpop.f32.mrf.mxu0  ;;  %4518 = vmatmul.mubr.f32.gmra.mxu0 %v4428_v22 }
  0xea   : > { %4540 = vmatpush3.msra.mxu1 %v3864_v23  ;;  %4567 = vmatpush3.msra.mxu0 %v1182_v42 }
  0xeb   : > { %4541 = vmatprep.subr.mxu1 %v3863_v25  ;;  %v740_v28 = vpop.f32.mrf.mxu0  ;;  %4568 = vmatprep.subr.mxu0 %v1181_v44 }
  0xec   : > { %4542 = vmatpush3.msra.mxu1 %v3863_v25  ;;  %4520 = vmatprep.mubr.f32.mxu0 %v740_v28 }
  0xed   : > { %4543 = vmatprep.subr.mxu1 %v3862_v27  ;;  %4521 = vmatmul.mubr.f32.gmra.mxu0 %v4431_v26  ;;  %v4434_v30 = vpop.f32.mrf.mxu0 }
  0xee   : > { %4544 = vmatpush3.msra.mxu1 %v3862_v27  ;;  %4569 = vmatpush3.msra.mxu0 %v1181_v44 }
  0xef   : > { %4545 = vmatprep.subr.mxu1 %v3861_v29  ;;  %v750_v32 = vpop.f32.mrf.mxu0  ;;  %4570 = vmatprep.subr.mxu0 %v1180_v46 }
  0xf0   : > { %4546 = vmatpush3.msra.mxu1 %v3861_v29  ;;  %4555 = vmatprep.mubr.f32.mxu1 %v750_v32 }
  0xf1   : > { %4547 = vmatprep.subr.mxu1 %v3860_v31  ;;  %v4437_v34 = vpop.f32.mrf.mxu0  ;;  %4571 = vmatpush3.msra.mxu0 %v1180_v46 }
  0xf2   : > { %4548 = vmatpush3.msra.mxu1 %v3860_v31  ;;  %4572 = vmatprep.subr.mxu0 %v1179_v48 }
  0xf3   : > { %4549 = vmatprep.subr.mxu1 %v3859_v33  ;;  %v760_v36 = vpop.f32.mrf.mxu0  ;;  %4573 = vmatpush3.msra.mxu0 %v1179_v48 }
  0xf4   : > { %4550 = vmatpush3.msra.mxu1 %v3859_v33  ;;  %4574 = vmatprep.subr.mxu0 %v1178_v50 }
  0xf5   : > { %4551 = vmatprep.subr.mxu1 %v3858_v35  ;;  %v4440_v38 = vpop.f32.mrf.mxu0  ;;  %4575 = vmatpush3.msra.mxu0 %v1178_v50  ;;  %v5096_v50 = vmov 0.0  }
  0xf6   : > { %4552 = vmatpush3.msra.mxu1 %v3858_v35  ;;  %4576 = vmatprep.subr.mxu0 %v1177_v52 }
  0xf7   : > { %4553 = vmatprep.subr.mxu1 %v3857_v37  ;;  %v770_v39 = vpop.f32.mrf.mxu0  ;;  %4577 = vmatpush3.msra.mxu0 %v1177_v52 }
  0xf8   : > { %4554 = vmatpush3.msra.mxu1 %v3857_v37  ;;  %4578 = vmatprep.subr.mxu0 %v1176_v54 }
  0xf9   : > { %4556 = vmatmul.mubr.f32.vlgmr.msra.gmra.mxu1 %v4434_v30  ;;  %4605 = vmatprep.subr.mxu1 %v3888_v41 }
  0xfa   : > { %4558 = vmatprep.mubr.f32.mxu1 %v760_v36  ;;  %4606 = vmatpush3.msra.mxu1 %v3888_v41 }
  0xfb   : > { %4607 = vmatprep.subr.mxu1 %v3887_v43  ;;  %4579 = vmatpush3.msra.mxu0 %v1176_v54 }
  0xfc   : > { %4608 = vmatpush3.msra.mxu1 %v3887_v43  ;;  %4580 = vmatprep.subr.mxu0 %v1175_v56 }
  0xfd   : > { %4559 = vmatmul.mubr.f32.gmra.mxu1 %v4437_v34  ;;  %4609 = vmatprep.subr.mxu1 %v3886_v45  ;;  %v919_v34 = vpop.permute.xlu0 %918 }
  0xfe   : > { %4561 = vmatprep.mubr.f32.mxu1 %v770_v39  ;;  %4610 = vmatpush3.msra.mxu1 %v3886_v45  ;;  %v924_v39 = vpop.permute.xlu1 %923 }
  0xff   : > { %4611 = vmatprep.subr.mxu1 %v3885_v47  ;;  %4581 = vmatpush3.msra.mxu0 %v1175_v56 }
 0x100   : > { %4612 = vmatpush3.msra.mxu1 %v3885_v47  ;;  %4582 = vmatprep.subr.mxu0 %v1174_v58 }
 0x101   : > { %4562 = vmatmul.mubr.f32.gmra.mxu1 %v4440_v38  ;;  %4613 = vmatprep.subr.mxu1 %v3884_v49 }
 0x102   : > { %4614 = vmatpush3.msra.mxu1 %v3884_v49  ;;  %4583 = vmatpush3.msra.mxu0 %v1174_v58 }
 0x103   : > { %4615 = vmatprep.subr.mxu1 %v3883_v51  ;;  %4584 = vmatprep.subr.mxu0 %v1173_v60 }
 0x104   : > { %4616 = vmatpush3.msra.mxu1 %v3883_v51  ;;  %4585 = vmatpush3.msra.mxu0 %v1173_v60 }
 0x105   : > { %4617 = vmatprep.subr.mxu1 %v3882_v53  ;;  %4586 = vmatprep.subr.mxu0 %v1172_v62 }
 0x106   : > { %4618 = vmatpush3.msra.mxu1 %v3882_v53  ;;  %4587 = vmatpush3.msra.mxu0 %v1172_v62 }
 0x107   : > { %4619 = vmatprep.subr.mxu1 %v3881_v55  ;;  %4588 = vmatprep.subr.mxu0 %v1171_v0 }
 0x108   : > { %4620 = vmatpush3.msra.mxu1 %v3881_v55  ;;  %4589 = vmatpush3.msra.mxu0 %v1171_v0 }
 0x109   : > { %4621 = vmatprep.subr.mxu1 %v3880_v57  ;;  %4590 = vmatprep.subr.mxu0 %v1170_v2 }
 0x10a   : > { %4622 = vmatpush3.msra.mxu1 %v3880_v57  ;;  %4591 = vmatpush3.msra.mxu0 %v1170_v2 }
 0x10b   : > { %4623 = vmatprep.subr.mxu1 %v3879_v59  ;;  %4592 = vmatprep.subr.mxu0 %v1169_v4 }
 0x10c   : > { %4624 = vmatpush3.msra.mxu1 %v3879_v59  ;;  %4593 = vmatpush3.msra.mxu0 %v1169_v4 }
 0x10d   : > { %4625 = vmatprep.subr.mxu1 %v3878_v61  ;;  %4594 = vmatprep.subr.mxu0 %v1168_v6 }
 0x10e   : > { %4626 = vmatpush3.msra.mxu1 %v3878_v61  ;;  %4595 = vmatpush3.msra.mxu0 %v1168_v6  ;;  %v1398_v6 = vld [vmem:[%s6184_s3 + $0x8] sm:$0xff] }
 0x10f   : > { %4627 = vmatprep.subr.mxu1 %v3877_v63  ;;  %4646 = vmatprep.subr.mxu0 %v5096_v50 }
 0x110   : > { %4628 = vmatpush3.msra.mxu1 %v3877_v63 }
 0x111   : > { %4629 = vmatprep.subr.mxu1 %v3876_v1 }
 0x112   : > { %4630 = vmatpush3.msra.mxu1 %v3876_v1 }
 0x113   : > { %4631 = vmatprep.subr.mxu1 %v3875_v3 }
 0x114   : > { %4632 = vmatpush3.msra.mxu1 %v3875_v3 }
 0x115   : > { %4633 = vmatprep.subr.mxu1 %v3874_v5 }
 0x116   : > { %4634 = vmatpush3.msra.mxu1 %v3874_v5  ;;  %v1397_v5 = vld [vmem:[%s6184_s3] sm:$0xff] }
 0x117   : > { %4635 = vmatprep.subr.mxu1 %v3873_v7 }
 0x118   : > { %4636 = vmatpush3.msra.mxu1 %v3873_v7  ;;  %v1399_v7 = vld [vmem:[%s6184_s3 + $0x10] sm:$0xff] }
 0x199   : > { %v4475_v8 = vpop.f32.mrf.mxu1 }
 0x19a   : > { %v927_v22 = vadd.f32 %v4475_v8, %v904_v20  ;;  %v3892_v8 = vld [vmem:[%s6184_s3 + $0x18] sm:$0xff] }
 0x19b   : > { %v867_v9 = vpop.f32.mrf.mxu1 }
 0x19c   : > { %v926_v21 = vadd.f32 %v899_v14, %v867_v9  ;;  %v3893_v9 = vld [vmem:[%s6184_s3 + $0x20] sm:$0xff]  ;;  %v1828_v14 = vld [vmem:[%s6187_s6 + $0x28] sm:$0xff] }
 0x19d   : > { %v4478_v10 = vpop.f32.mrf.mxu1 }
 0x19e   : > { %v929_v31 = vadd.f32 %v4478_v10, %v914_v24  ;;  %v3894_v10 = vld [vmem:[%s6184_s3 + $0x28] sm:$0xff] }
 0x19f   : > { %v877_v12 = vpop.f32.mrf.mxu1 }
 0x1a0   : > { %v928_v29 = vadd.f32 %v909_v17, %v877_v12  ;;  %v1830_v12 = vld [vmem:[%s6187_s6 + $0x38] sm:$0xff]  ;;  %v1825_v17 = vld [vmem:[%s6187_s6 + $0x10] sm:$0xff] }
 0x1a1   : > { %v4481_v15 = vpop.f32.mrf.mxu1  ;;  %4721 = vmatprep.subr.mxu1 %v1830_v12 }
 0x1a2   : > { %v931_v42 = vadd.f32 %v4481_v15, %v924_v39  ;;  %v1827_v15 = vld [vmem:[%s6187_s6 + $0x20] sm:$0xff]  ;;  %v1591_v39 = vld [vmem:[%s6186_s5 + $0x10] sm:$0xff] }
 0x1a3   : > { %v887_v18 = vpop.f32.mrf.mxu1 }
 0x1a4   : > { %v930_v40 = vadd.f32 %v919_v34, %v887_v18  ;;  %v1824_v18 = vld [vmem:[%s6187_s6 + $0x8] sm:$0xff] }
 0x1a5   : > { %v4516_v11 = vpop.f32.mrf.mxu0 }
 0x1a6   : > { %v1045_v26 = vadd.f32 %v4516_v11, %v927_v22  ;;  %v1589_v11 = vld [vmem:[%s6186_s5] sm:$0xff] }
 0x1a7   : > { %v1015_v13 = vpop.f32.mrf.mxu0 }
 0x1a8   : > { %v1044_v25 = vadd.f32 %v1015_v13, %v926_v21  ;;  %v1829_v13 = vld [vmem:[%s6187_s6 + $0x30] sm:$0xff] }
 0x1a9   : > { %v4519_v16 = vpop.f32.mrf.mxu0 }
 0x1aa   : > { %v1047_v36 = vadd.f32 %v4519_v16, %v929_v31  ;;  %v1826_v16 = vld [vmem:[%s6187_s6 + $0x18] sm:$0xff] }
 0x1ab   : > { %v1025_v19 = vpop.f32.mrf.mxu0 }
 0x1ac   : > { %v1046_v35 = vadd.f32 %v1025_v19, %v928_v29 }
 0x1ad   : > { %v4522_v27 = vpop.f32.mrf.mxu0 }
 0x1ae   : > { %v1049_v46 = vadd.f32 %v4522_v27, %v931_v42  ;;  %v1594_v42 = vld [vmem:[%s6186_s5 + $0x28] sm:$0xff] }
 0x1af   : > { %v1035_v37 = vpop.f32.mrf.mxu0 }
 0x1b0   : > { %v1048_v45 = vadd.f32 %v1035_v37, %v930_v40  ;;  %v1590_v37 = vld [vmem:[%s6186_s5 + $0x8] sm:$0xff]  ;;  %v1592_v40 = vld [vmem:[%s6186_s5 + $0x18] sm:$0xff] }
 0x1b9   : > { %v4557_v23 = vpop.f32.mrf.mxu1 }
 0x1ba   : > { %v1163_v32 = vadd.f32 %v4557_v23, %v1045_v26 }
 0x1bb   : > { %v1133_v28 = vpop.f32.mrf.mxu1 }
 0x1bc   : > { %v1162_v30 = vadd.f32 %v1133_v28, %v1044_v25 }
 0x1bd   : > { %v4560_v33 = vpop.f32.mrf.mxu1 }
 0x1be   : > { %4596 = vmatprep.mubr.f32.mxu0 %v1162_v30  ;;  %4637 = vmatprep.mubr.f32.mxu1 %v1162_v30  ;;  %v1165_v43 = vadd.f32 %v4560_v33, %v1047_v36 }
 0x1bf   : > { %v1143_v38 = vpop.f32.mrf.mxu1  ;;  %4597 = vmatmul.mubr.f32.vlgmr.msra.gmra.mxu0 %v1163_v32  ;;  %4638 = vmatmul.mubr.f32.vlgmr.msra.gmra.mxu1 %v1163_v32 }
 0x1c0   : > { %v1164_v41 = vadd.f32 %v1143_v38, %v1046_v35  ;;  %4722 = vmatpush3.msra.mxu1 %v1830_v12  ;;  %v3943_v38 = vld [vmem:[%s6187_s6 + $0xb8] sm:$0xff] }
 0x1c1   : > { %v4563_v44 = vpop.f32.mrf.mxu1  ;;  %4723 = vmatprep.subr.mxu1 %v1829_v13 }
 0x1c2   : > { %4599 = vmatprep.mubr.f32.mxu0 %v1164_v41  ;;  %4640 = vmatprep.mubr.f32.mxu1 %v1164_v41  ;;  %v1167_v49 = vadd.f32 %v4563_v44, %v1049_v46  ;;  %v1593_v41 = vld [vmem:[%s6186_s5 + $0x20] sm:$0xff]  ;;  %v1596_v44 = vld [vmem:[%s6186_s5 + $0x38] sm:$0xff]  ;;  %v1598_v46 = vld [vmem:[%s6186_s5 + $0x48] sm:$0xff] }
 0x1c3   : > { %v1153_v47 = vpop.f32.mrf.mxu1  ;;  %4600 = vmatmul.mubr.f32.gmra.mxu0 %v1165_v43  ;;  %4641 = vmatmul.mubr.f32.gmra.mxu1 %v1165_v43  ;;  %v1595_v43 = vld [vmem:[%s6186_s5 + $0x30] sm:$0xff] }
 0x1c4   : > { %v1166_v48 = vadd.f32 %v1153_v47, %v1048_v45  ;;  %4724 = vmatpush3.msra.mxu1 %v1829_v13  ;;  %v1597_v45 = vld [vmem:[%s6186_s5 + $0x40] sm:$0xff]  ;;  %v1599_v47 = vld [vmem:[%s6186_s5 + $0x50] sm:$0xff]  ;;  %v3923_v13 = vld [vmem:[%s6187_s6 + $0x48] sm:$0xff] }
 0x1c5   : > { %4725 = vmatprep.subr.mxu1 %v1828_v14 }
 0x1c6   : > { %4602 = vmatprep.mubr.f32.mxu0 %v1166_v48  ;;  %4643 = vmatprep.mubr.f32.mxu1 %v1166_v48  ;;  %v1600_v48 = vld [vmem:[%s6186_s5 + $0x58] sm:$0xff] }
 0x1c7   : > { %4603 = vmatmul.mubr.f32.gmra.mxu0 %v1167_v49  ;;  %4644 = vmatmul.mubr.f32.gmra.mxu1 %v1167_v49  ;;  %v1601_v49 = vld [vmem:[%s6186_s5 + $0x60] sm:$0xff] }
 0x1c8   : > { %4658 = vmatprep.mubr.msk.f32.mxu0 %vm5097_vm1, %v5096_v50  ;;  %4726 = vmatpush3.msra.mxu1 %v1828_v14 }
 0x1c9   : > { %4727 = vmatprep.subr.mxu1 %v1827_v15 }
 0x1ca   : > { %4728 = vmatpush3.msra.mxu1 %v1827_v15  ;;  %v3922_v15 = vld [vmem:[%s6187_s6 + $0x40] sm:$0xff] }
 0x1cb   : > { %4729 = vmatprep.subr.mxu1 %v1826_v16 }
 0x1cc   : > { %4730 = vmatpush3.msra.mxu1 %v1826_v16 }
 0x1cd   : > { %4731 = vmatprep.subr.mxu1 %v1825_v17 }
 0x1ce   : > { %4732 = vmatpush3.msra.mxu1 %v1825_v17 }
 0x1cf   : > { %4733 = vmatprep.subr.mxu1 %v1824_v18 }
 0x1d0   : > { %4734 = vmatpush3.msra.mxu1 %v1824_v18 }
 0x27f   : > { %v4598_v51 = vpop.f32.mrf.mxu0  ;;  %v4639_v52 = vpop.f32.mrf.mxu1 }
 0x280   : > { %v1392_v3 = vmax.f32 %v4598_v51, %v4639_v52  ;;  %v1602_v51 = vld [vmem:[%s6186_s5 + $0x68] sm:$0xff]  ;;  %v1603_v52 = vld [vmem:[%s6186_s5 + $0x70] sm:$0xff] }
 0x281   : > { %v1250_v53 = vpop.f32.mrf.mxu0  ;;  %v1362_v54 = vpop.f32.mrf.mxu1 }
 0x282   : > { %v1391_v4 = vmax.f32 %v1250_v53, %v1362_v54  ;;  %v1604_v53 = vld [vmem:[%s6186_s5 + $0x78] sm:$0xff]  ;;  %v1605_v54 = vld [vmem:[%s6186_s5 + $0x80] sm:$0xff] }
 0x283   : > { %v4601_v55 = vpop.f32.mrf.mxu0  ;;  %v4642_v56 = vpop.f32.mrf.mxu1 }
 0x284   : > { %v1394_v1 = vmax.f32 %v4601_v55, %v4642_v56  ;;  %v1606_v55 = vld [vmem:[%s6186_s5 + $0x88] sm:$0xff]  ;;  %v1823_v56 = vld [vmem:[%s6187_s6] sm:$0xff] }
 0x285   : > { %v1260_v57 = vpop.f32.mrf.mxu0  ;;  %v1372_v58 = vpop.f32.mrf.mxu1  ;;  %4735 = vmatprep.subr.mxu1 %v1823_v56 }
 0x286   : > { %v1393_v2 = vmax.f32 %v1260_v57, %v1372_v58  ;;  %4736 = vmatpush3.msra.mxu1 %v1823_v56  ;;  %v3929_v57 = vld [vmem:[%s6187_s6 + $0x78] sm:$0xff]  ;;  %v3942_v58 = vld [vmem:[%s6187_s6 + $0xb0] sm:$0xff] }
 0x287   : > { %v4604_v59 = vpop.f32.mrf.mxu0  ;;  %v4645_v60 = vpop.f32.mrf.mxu1  ;;  %4746 = vmatprep.subr.mxu1 %v3929_v57 }
 0x288   : > { %v1396_v61 = vmax.f32 %v4604_v59, %v4645_v60  ;;  %v3941_v59 = vld [vmem:[%s6187_s6 + $0xa8] sm:$0xff]  ;;  %v3940_v60 = vld [vmem:[%s6187_s6 + $0xa0] sm:$0xff] }
 0x289   : > { %v1270_v62 = vpop.f32.mrf.mxu0  ;;  %v1382_v63 = vpop.f32.mrf.mxu1 }
 0x28a   : > { %v1395_v0 = vmax.f32 %v1270_v62, %v1382_v63  ;;  %4647 = vmatpush3.msra.mxu0 %v1396_v61  ;;  %v3938_v62 = vld [vmem:[%s6187_s6 + $0x90] sm:$0xff]  ;;  %v3937_v63 = vld [vmem:[%s6187_s6 + $0x88] sm:$0xff] }
 0x28b   : > { %4648 = vmatprep.subr.mxu0 %v5096_v50 }
 0x28c   : > { %4649 = vmatpush3.msra.mxu0 %v1395_v0 }
 0x28d   : > { %4650 = vmatprep.subr.mxu0 %v5096_v50 }
 0x28e   : > { %4651 = vmatpush3.msra.mxu0 %v1394_v1 }
 0x28f   : > { %4652 = vmatprep.subr.mxu0 %v5096_v50 }
 0x290   : > { %4653 = vmatpush3.msra.mxu0 %v1393_v2 }
 0x291   : > { %4654 = vmatprep.subr.mxu0 %v5096_v50 }
 0x292   : > { %4655 = vmatpush3.msra.mxu0 %v1392_v3 }
 0x293   : > { %4656 = vmatprep.subr.mxu0 %v5096_v50 }
 0x294   : > { %4657 = vmatpush3.msra.mxu0 %v1391_v4 }
 0x295   : > { %4659 = vmatmul.mubr.msk.f32.vlgmr.msra.gmra.mxu0 %vm1400_vm2, %v1397_v5  ;;  %4667 = vmatprep.subr.mxu0 %v5096_v50  ;;  %v3927_v5 = vld [vmem:[%s6187_s6 + $0x68] sm:$0xff] }
 0x296   : > { %4668 = vmatpush3.msra.mxu0 %v1396_v61  ;;  %4661 = vmatprep.mubr.msk.f32.mxu0 %vm5097_vm1, %v5096_v50  ;;  %v3939_v61 = vld [vmem:[%s6187_s6 + $0x98] sm:$0xff] }
 0x297   : > { %4669 = vmatprep.subr.mxu0 %v5096_v50 }
 0x298   : > { %4670 = vmatpush3.msra.mxu0 %v1395_v0  ;;  %v3936_v0 = vld [vmem:[%s6187_s6 + $0x80] sm:$0xff] }
 0x299   : > { %4662 = vmatmul.mubr.msk.f32.gmra.mxu0 %vm1400_vm2, %v1398_v6  ;;  %4671 = vmatprep.subr.mxu0 %v5096_v50 }
 0x29a   : > { %4672 = vmatpush3.msra.mxu0 %v1394_v1  ;;  %4664 = vmatprep.mubr.msk.f32.mxu0 %vm5097_vm1, %v5096_v50 }
 0x29b   : > { %4673 = vmatprep.subr.mxu0 %v5096_v50 }
 0x29c   : > { %4674 = vmatpush3.msra.mxu0 %v1393_v2 }
 0x29d   : > { %4665 = vmatmul.mubr.msk.f32.gmra.mxu0 %vm1400_vm2, %v1399_v7  ;;  %4675 = vmatprep.subr.mxu0 %v5096_v50  ;;  %v3926_v7 = vld [vmem:[%s6187_s6 + $0x60] sm:$0xff] }
 0x29e   : > { %4676 = vmatpush3.msra.mxu0 %v1392_v3  ;;  %4679 = vmatprep.mubr.msk.f32.mxu0 %vm5097_vm1, %v5096_v50  ;;  %v3928_v3 = vld [vmem:[%s6187_s6 + $0x70] sm:$0xff] }
 0x29f   : > { %4677 = vmatprep.subr.mxu0 %v5096_v50 }
 0x2a0   : > { %4678 = vmatpush3.msra.mxu0 %v1391_v4 }
 0x2a1   : > { %4680 = vmatmul.mubr.msk.f32.vlgmr.msra.gmra.mxu0 %vm1400_vm2, %v3892_v8 }
 0x2a2   : > { %4682 = vmatprep.mubr.msk.f32.mxu0 %vm5097_vm1, %v5096_v50 }
 0x2a5   : > { %4683 = vmatmul.mubr.msk.f32.gmra.mxu0 %vm1400_vm2, %v3893_v9  ;;  %v3925_v9 = vld [vmem:[%s6187_s6 + $0x58] sm:$0xff] }
 0x2a6   : > { %4685 = vmatprep.mubr.msk.f32.mxu0 %vm5097_vm1, %v5096_v50 }
 0x2a9   : > { %4686 = vmatmul.mubr.msk.f32.gmra.mxu0 %vm1400_vm2, %v3894_v10 }
 0x2aa   : > { %4694 = vmatprep.mubr.msk.f32.mxu0 %vm1607_vm3, %v1589_v11  ;;  %v3924_v11 = vld [vmem:[%s6187_s6 + $0x50] sm:$0xff] }
 0x355   : > { %v1476_v19 = vpop.f32.mrf.mxu0 }
 0x357   : > { %v4660_v20 = vpop.f32.mrf.mxu0 }
 0x359   : > { %v1481_v21 = vpop.f32.mrf.mxu0 }
 0x35b   : > { %v4663_v22 = vpop.f32.mrf.mxu0 }
 0x35d   : > { %v1486_v23 = vpop.f32.mrf.mxu0 }
 0x35f   : > { %v4666_v24 = vpop.f32.mrf.mxu0 }
 0x361   : > { %v1569_v25 = vpop.f32.mrf.mxu0 }
 0x362   : > { %v1583_v33 = vmax.f32 %v1476_v19, %v1569_v25 }
 0x363   : > { %v4681_v26 = vpop.f32.mrf.mxu0 }
 0x364   : > { %v1586_v36 = vmax.f32 %v1583_v33, 0.0  ;;  %v2244_v26 = vld [vmem:[%s6188_s7 + $0x38] sm:$0xff]  ;;  %v3960_v33 = vld [vmem:[%s6188_s7 + $0x60] sm:$0xff] }
 0x365   : > { %v1574_v27 = vpop.f32.mrf.mxu0 }
 0x366   : > { %v1584_v30 = vmax.f32 %v1481_v21, %v1574_v27  ;;  %v3963_v27 = vld [vmem:[%s6188_s7 + $0x78] sm:$0xff] }
 0x367   : > { %v4684_v28 = vpop.f32.mrf.mxu0 }
 0x368   : > { %v1587_v35 = vmax.f32 %v1584_v30, 0.0  ;;  %v2243_v28 = vld [vmem:[%s6188_s7 + $0x30] sm:$0xff]  ;;  %v2242_v30 = vld [vmem:[%s6188_s7 + $0x28] sm:$0xff] }
 0x369   : > { %v1579_v29 = vpop.f32.mrf.mxu0 }
 0x36a   : > { %v1585_v31 = vmax.f32 %v1486_v23, %v1579_v29  ;;  %v3962_v29 = vld [vmem:[%s6188_s7 + $0x70] sm:$0xff] }
 0x36b   : > { %v4687_v32 = vpop.f32.mrf.mxu0 }
 0x36c   : > { %v1588_v34 = vmax.f32 %v1585_v31, 0.0  ;;  %v3961_v31 = vld [vmem:[%s6188_s7 + $0x68] sm:$0xff]  ;;  %v2241_v32 = vld [vmem:[%s6188_s7 + $0x20] sm:$0xff] }
 0x36e   : > { %4688 = vmatprep.subr.mxu0 %v1588_v34 }
 0x36f   : > { %4689 = vmatpush3.msra.mxu0 %v1588_v34  ;;  %v2240_v34 = vld [vmem:[%s6188_s7 + $0x18] sm:$0xff] }
 0x370   : > { %4690 = vmatprep.subr.mxu0 %v1587_v35 }
 0x371   : > { %4691 = vmatpush3.msra.mxu0 %v1587_v35  ;;  %v3959_v35 = vld [vmem:[%s6188_s7 + $0x58] sm:$0xff] }
 0x372   : > { %4692 = vmatprep.subr.mxu0 %v1586_v36 }
 0x373   : > { %4693 = vmatpush3.msra.mxu0 %v1586_v36  ;;  %v2239_v36 = vld [vmem:[%s6188_s7 + $0x10] sm:$0xff] }
 0x374   : > { %4695 = vmatmul.mubr.msk.f32.vlgmr.msra.gmra.mxu0 %vm1607_vm3, %v1590_v37  ;;  %4771 = vmatprep.subr.mxu0 %v3943_v38  ;;  %v3958_v37 = vld [vmem:[%s6188_s7 + $0x50] sm:$0xff] }
 0x375   : > { %4697 = vmatprep.mubr.msk.f32.mxu0 %vm1607_vm3, %v1591_v39  ;;  %4772 = vmatpush3.msra.mxu0 %v3943_v38  ;;  %v2238_v38 = vld [vmem:[%s6188_s7 + $0x8] sm:$0xff] }
 0x376   : > { %4773 = vmatprep.subr.mxu0 %v3942_v58  ;;  %v3957_v39 = vld [vmem:[%s6188_s7 + $0x48] sm:$0xff] }
 0x377   : > { %4774 = vmatpush3.msra.mxu0 %v3942_v58 }
 0x378   : > { %4698 = vmatmul.mubr.msk.f32.gmra.mxu0 %vm1607_vm3, %v1592_v40  ;;  %4775 = vmatprep.subr.mxu0 %v3941_v59  ;;  %v2237_v40 = vld [vmem:[%s6188_s7] sm:$0xff] }
 0x379   : > { %4700 = vmatprep.mubr.msk.f32.mxu0 %vm1607_vm3, %v1593_v41  ;;  %4776 = vmatpush3.msra.mxu0 %v3941_v59  ;;  %v3956_v41 = vld [vmem:[%s6188_s7 + $0x40] sm:$0xff] }
 0x37a   : > { %4777 = vmatprep.subr.mxu0 %v3940_v60 }
 0x37b   : > { %4778 = vmatpush3.msra.mxu0 %v3940_v60 }
 0x37c   : > { %4701 = vmatmul.mubr.msk.f32.gmra.mxu0 %vm1607_vm3, %v1594_v42  ;;  %4779 = vmatprep.subr.mxu0 %v3939_v61 }
 0x37d   : > { %4703 = vmatprep.mubr.msk.f32.mxu0 %vm1607_vm3, %v1595_v43  ;;  %4780 = vmatpush3.msra.mxu0 %v3939_v61 }
 0x37e   : > { %4781 = vmatprep.subr.mxu0 %v3938_v62 }
 0x37f   : > { %4782 = vmatpush3.msra.mxu0 %v3938_v62 }
 0x380   : > { %4704 = vmatmul.mubr.msk.f32.gmra.mxu0 %vm1607_vm3, %v1596_v44  ;;  %4783 = vmatprep.subr.mxu0 %v3937_v63 }
 0x381   : > { %4706 = vmatprep.mubr.msk.f32.mxu0 %vm1607_vm3, %v1597_v45  ;;  %4784 = vmatpush3.msra.mxu0 %v3937_v63 }
 0x382   : > { %4785 = vmatprep.subr.mxu0 %v3936_v0 }
 0x383   : > { %4786 = vmatpush3.msra.mxu0 %v3936_v0 }
 0x384   : > { %4707 = vmatmul.mubr.msk.f32.gmra.mxu0 %vm1607_vm3, %v1598_v46  ;;  %4821 = vmatprep.subr.mxu0 %v3963_v27 }
 0x385   : > { %4709 = vmatprep.mubr.msk.f32.mxu0 %vm1607_vm3, %v1599_v47 }
 0x388   : > { %4710 = vmatmul.mubr.msk.f32.gmra.mxu0 %vm1607_vm3, %v1600_v48 }
 0x389   : > { %4712 = vmatprep.mubr.msk.f32.mxu0 %vm1607_vm3, %v1601_v49  ;;  %v1948_v49 = vpop.permute.xlu0 %1947 }
 0x38c   : > { %4713 = vmatmul.mubr.msk.f32.gmra.mxu0 %vm1607_vm3, %v1602_v51 }
 0x38d   : > { %4715 = vmatprep.mubr.msk.f32.mxu0 %vm1607_vm3, %v1603_v52  ;;  %v1953_v52 = vpop.permute.xlu1 %1952 }
 0x390   : > { %4716 = vmatmul.mubr.msk.f32.gmra.mxu0 %vm1607_vm3, %v1604_v53 }
 0x391   : > { %4718 = vmatprep.mubr.msk.f32.mxu0 %vm1607_vm3, %v1605_v54  ;;  %v1963_v59 = vpop.permute.xlu1 %1962 }
 0x394   : > { %4719 = vmatmul.mubr.msk.f32.gmra.mxu0 %vm1607_vm3, %v1606_v55  ;;  %v1958_v55 = vpop.permute.xlu0 %1957 }
 0x434   : > { %v4696_v1 = vpop.f32.mrf.mxu0 }
 0x436   : > { %v1728_v2 = vpop.f32.mrf.mxu0 }
 0x437   : > { %4737 = vmatprep.mubr.msk.f32.mxu1 %vm1831_vm4, %v1728_v2 }
 0x438   : > { %v4699_v4 = vpop.f32.mrf.mxu0  ;;  %4738 = vmatmul.mubr.msk.f32.vlgmr.msra.gmra.mxu1 %vm1831_vm4, %v4696_v1 }
 0x439   : > { %4747 = vmatpush3.msra.mxu1 %v3929_v57 }
 0x43a   : > { %4748 = vmatprep.subr.mxu1 %v3928_v3  ;;  %v1738_v6 = vpop.f32.mrf.mxu0 }
 0x43b   : > { %4749 = vmatpush3.msra.mxu1 %v3928_v3  ;;  %4740 = vmatprep.mubr.msk.f32.mxu1 %vm1831_vm4, %v1738_v6 }
 0x43c   : > { %4750 = vmatprep.subr.mxu1 %v3927_v5  ;;  %v4702_v8 = vpop.f32.mrf.mxu0  ;;  %4741 = vmatmul.mubr.msk.f32.gmra.mxu1 %vm1831_vm4, %v4699_v4 }
 0x43d   : > { %4751 = vmatpush3.msra.mxu1 %v3927_v5  ;;  %v1968_v5 = vpop.permute.xlu0 %1967 }
 0x43e   : > { %4752 = vmatprep.subr.mxu1 %v3926_v7  ;;  %v1748_v10 = vpop.f32.mrf.mxu0 }
 0x43f   : > { %4753 = vmatpush3.msra.mxu1 %v3926_v7  ;;  %4743 = vmatprep.mubr.msk.f32.mxu1 %vm1831_vm4, %v1748_v10  ;;  %v1973_v10 = vpop.permute.xlu1 %1972 }
 0x440   : > { %4754 = vmatprep.subr.mxu1 %v3925_v9  ;;  %v4705_v12 = vpop.f32.mrf.mxu0  ;;  %4744 = vmatmul.mubr.msk.f32.gmra.mxu1 %vm1831_vm4, %v4702_v8 }
 0x441   : > { %4755 = vmatpush3.msra.mxu1 %v3925_v9 }
 0x442   : > { %4756 = vmatprep.subr.mxu1 %v3924_v11  ;;  %v1758_v14 = vpop.f32.mrf.mxu0 }
 0x443   : > { %4757 = vmatpush3.msra.mxu1 %v3924_v11  ;;  %4762 = vmatprep.mubr.msk.f32.mxu1 %vm1831_vm4, %v1758_v14 }
 0x444   : > { %4758 = vmatprep.subr.mxu1 %v3923_v13  ;;  %v4708_v16 = vpop.f32.mrf.mxu0 }
 0x445   : > { %4759 = vmatpush3.msra.mxu1 %v3923_v13 }
 0x446   : > { %4760 = vmatprep.subr.mxu1 %v3922_v15  ;;  %v1768_v17 = vpop.f32.mrf.mxu0 }
 0x447   : > { %4761 = vmatpush3.msra.mxu1 %v3922_v15 }
 0x448   : > { %4763 = vmatmul.mubr.msk.f32.vlgmr.msra.gmra.mxu1 %vm1831_vm4, %v4705_v12  ;;  %v4711_v18 = vpop.f32.mrf.mxu0  ;;  %4796 = vmatprep.subr.mxu1 %v2244_v26 }
 0x449   : > { %4765 = vmatprep.mubr.msk.f32.mxu1 %vm1831_vm4, %v1768_v17  ;;  %4797 = vmatpush3.msra.mxu1 %v2244_v26 }
 0x44a   : > { %v1778_v19 = vpop.f32.mrf.mxu0  ;;  %4798 = vmatprep.subr.mxu1 %v2243_v28 }
 0x44b   : > { %4799 = vmatpush3.msra.mxu1 %v2243_v28 }
 0x44c   : > { %4766 = vmatmul.mubr.msk.f32.gmra.mxu1 %vm1831_vm4, %v4708_v16  ;;  %v4714_v20 = vpop.f32.mrf.mxu0  ;;  %4800 = vmatprep.subr.mxu1 %v2242_v30 }
 0x44d   : > { %4768 = vmatprep.mubr.msk.f32.mxu1 %vm1831_vm4, %v1778_v19  ;;  %4801 = vmatpush3.msra.mxu1 %v2242_v30 }
 0x44e   : > { %v1788_v21 = vpop.f32.mrf.mxu0  ;;  %4802 = vmatprep.subr.mxu1 %v2241_v32 }
 0x44f   : > { %4787 = vmatprep.mubr.msk.f32.mxu0 %vm1831_vm4, %v1788_v21  ;;  %4803 = vmatpush3.msra.mxu1 %v2241_v32 }
 0x450   : > { %4769 = vmatmul.mubr.msk.f32.gmra.mxu1 %vm1831_vm4, %v4711_v18  ;;  %v4717_v22 = vpop.f32.mrf.mxu0  ;;  %4788 = vmatmul.mubr.msk.f32.vlgmr.msra.gmra.mxu0 %vm1831_vm4, %v4714_v20 }
 0x451   : > { %4822 = vmatpush3.msra.mxu0 %v3963_v27  ;;  %4804 = vmatprep.subr.mxu1 %v2240_v34 }
 0x452   : > { %v1798_v23 = vpop.f32.mrf.mxu0  ;;  %4823 = vmatprep.subr.mxu0 %v3962_v29  ;;  %4805 = vmatpush3.msra.mxu1 %v2240_v34 }
 0x453   : > { %4790 = vmatprep.mubr.msk.f32.mxu0 %vm1831_vm4, %v1798_v23  ;;  %4824 = vmatpush3.msra.mxu0 %v3962_v29 }
 0x454   : > { %v4720_v24 = vpop.f32.mrf.mxu0  ;;  %4791 = vmatmul.mubr.msk.f32.gmra.mxu0 %vm1831_vm4, %v4717_v22  ;;  %4825 = vmatprep.subr.mxu0 %v3961_v31 }
 0x455   : > { %4826 = vmatpush3.msra.mxu0 %v3961_v31  ;;  %4806 = vmatprep.subr.mxu1 %v2239_v36 }
 0x456   : > { %v1808_v25 = vpop.f32.mrf.mxu0  ;;  %4827 = vmatprep.subr.mxu0 %v3960_v33  ;;  %4807 = vmatpush3.msra.mxu1 %v2239_v36 }
 0x457   : > { %4793 = vmatprep.mubr.msk.f32.mxu0 %vm1831_vm4, %v1808_v25  ;;  %4828 = vmatpush3.msra.mxu0 %v3960_v33 }
 0x458   : > { %4794 = vmatmul.mubr.msk.f32.gmra.mxu0 %vm1831_vm4, %v4720_v24  ;;  %4829 = vmatprep.subr.mxu0 %v3959_v35 }
 0x459   : > { %4830 = vmatpush3.msra.mxu0 %v3959_v35  ;;  %4808 = vmatprep.subr.mxu1 %v2238_v38 }
 0x45a   : > { %4831 = vmatprep.subr.mxu0 %v3958_v37  ;;  %4809 = vmatpush3.msra.mxu1 %v2238_v38 }
 0x45b   : > { %4832 = vmatpush3.msra.mxu0 %v3958_v37  ;;  %4810 = vmatprep.subr.mxu1 %v2237_v40 }
 0x45c   : > { %4833 = vmatprep.subr.mxu0 %v3957_v39  ;;  %4811 = vmatpush3.msra.mxu1 %v2237_v40  ;;  %v2469_v40 = vld [vmem:[%s6189_s8 + $0x8] sm:$0xff] }
 0x45d   : > { %4834 = vmatpush3.msra.mxu0 %v3957_v39  ;;  %4846 = vmatprep.subr.mxu1 %v5096_v50  ;;  %v2468_v39 = vld [vmem:[%s6189_s8] sm:$0xff] }
 0x45e   : > { %4835 = vmatprep.subr.mxu0 %v3956_v41 }
 0x45f   : > { %4836 = vmatpush3.msra.mxu0 %v3956_v41  ;;  %v2470_v41 = vld [vmem:[%s6189_s8 + $0x10] sm:$0xff] }
 0x4f8   : > { %v4739_v42 = vpop.f32.mrf.mxu1 }
 0x4f9   : > { %v1976_v57 = vadd.f32 %v4739_v42, %v1953_v52  ;;  %v3973_v42 = vld [vmem:[%s6189_s8 + $0x18] sm:$0xff] }
 0x4fa   : > { %v1916_v43 = vpop.f32.mrf.mxu1 }
 0x4fb   : > { %v1975_v56 = vadd.f32 %v1948_v49, %v1916_v43  ;;  %v3974_v43 = vld [vmem:[%s6189_s8 + $0x20] sm:$0xff] }
 0x4fc   : > { %v4742_v44 = vpop.f32.mrf.mxu1 }
 0x4fd   : > { %v1978_v2 = vadd.f32 %v4742_v44, %v1963_v59  ;;  %v3975_v44 = vld [vmem:[%s6189_s8 + $0x28] sm:$0xff] }
 0x4fe   : > { %v1926_v45 = vpop.f32.mrf.mxu1 }
 0x4ff   : > { %v1977_v0 = vadd.f32 %v1958_v55, %v1926_v45  ;;  %v2659_v45 = vld [vmem:[%s6191_s10] sm:$0xff] }
 0x500   : > { %v4745_v46 = vpop.f32.mrf.mxu1 }
 0x501   : > { %v1980_v13 = vadd.f32 %v4745_v46, %v1973_v10  ;;  %v2838_v46 = vld [vmem:[%s6192_s11 + $0x18] sm:$0xff]  ;;  %v2667_v10 = vld [vmem:[%s6191_s10 + $0x40] sm:$0xff] }
 0x502   : > { %v1936_v47 = vpop.f32.mrf.mxu1 }
 0x503   : > { %v1979_v11 = vadd.f32 %v1968_v5, %v1936_v47  ;;  %v2837_v47 = vld [vmem:[%s6192_s11 + $0x10] sm:$0xff]  ;;  %v2662_v5 = vld [vmem:[%s6191_s10 + $0x18] sm:$0xff] }
 0x508   : > { %v4764_v48 = vpop.f32.mrf.mxu1 }
 0x509   : > { %v2104_v61 = vadd.f32 %v4764_v48, %v1976_v57 }
 0x50a   : > { %v2074_v51 = vpop.f32.mrf.mxu1 }
 0x50b   : > { %v2103_v60 = vadd.f32 %v2074_v51, %v1975_v56 }
 0x50c   : > { %v4767_v53 = vpop.f32.mrf.mxu1 }
 0x50d   : > { %v2106_v7 = vadd.f32 %v4767_v53, %v1978_v2 }
 0x50e   : > { %v2084_v54 = vpop.f32.mrf.mxu1 }
 0x50f   : > { %v2105_v6 = vadd.f32 %v2084_v54, %v1977_v0 }
 0x510   : > { %v4789_v58 = vpop.f32.mrf.mxu0  ;;  %v4770_v62 = vpop.f32.mrf.mxu1 }
 0x511   : > { %v2232_v3 = vadd.f32 %v4789_v58, %v2104_v61  ;;  %v2108_v17 = vadd.f32 %v4770_v62, %v1980_v13  ;;  %v2670_v13 = vld [vmem:[%s6191_s10 + $0x58] sm:$0xff] }
 0x512   : > { %v2202_v63 = vpop.f32.mrf.mxu0  ;;  %v2094_v8 = vpop.f32.mrf.mxu1 }
 0x513   : > { %v2231_v1 = vadd.f32 %v2202_v63, %v2103_v60  ;;  %v2107_v16 = vadd.f32 %v2094_v8, %v1979_v11  ;;  %v2665_v8 = vld [vmem:[%s6191_s10 + $0x30] sm:$0xff]  ;;  %v2668_v11 = vld [vmem:[%s6191_s10 + $0x48] sm:$0xff] }
 0x514   : > { %v4792_v4 = vpop.f32.mrf.mxu0 }
 0x515   : > { %4812 = vmatprep.mubr.msk.f32.mxu1 %vm1831_vm4, %v2231_v1  ;;  %4837 = vmatprep.mubr.msk.f32.mxu0 %vm1831_vm4, %v2231_v1  ;;  %v2234_v14 = vadd.f32 %v4792_v4, %v2106_v7  ;;  %v2661_v4 = vld [vmem:[%s6191_s10 + $0x10] sm:$0xff]  ;;  %v2664_v7 = vld [vmem:[%s6191_s10 + $0x28] sm:$0xff] }
 0x516   : > { %v2212_v9 = vpop.f32.mrf.mxu0  ;;  %4813 = vmatmul.mubr.msk.f32.vlgmr.msra.gmra.mxu1 %vm1831_vm4, %v2232_v3  ;;  %4838 = vmatmul.mubr.msk.f32.vlgmr.msra.gmra.mxu0 %vm1831_vm4, %v2232_v3  ;;  %v2660_v3 = vld [vmem:[%s6191_s10 + $0x8] sm:$0xff] }
 0x517   : > { %v2233_v12 = vadd.f32 %v2212_v9, %v2105_v6  ;;  %v2663_v6 = vld [vmem:[%s6191_s10 + $0x20] sm:$0xff]  ;;  %v2666_v9 = vld [vmem:[%s6191_s10 + $0x38] sm:$0xff] }
 0x518   : > { %v4795_v15 = vpop.f32.mrf.mxu0 }
 0x519   : > { %4815 = vmatprep.mubr.msk.f32.mxu1 %vm1831_vm4, %v2233_v12  ;;  %4840 = vmatprep.mubr.msk.f32.mxu0 %vm1831_vm4, %v2233_v12  ;;  %v2236_v20 = vadd.f32 %v4795_v15, %v2108_v17  ;;  %v2669_v12 = vld [vmem:[%s6191_s10 + $0x50] sm:$0xff]  ;;  %v2835_v15 = vld [vmem:[%s6192_s11] sm:$0xff] }
 0x51a   : > { %v2222_v18 = vpop.f32.mrf.mxu0  ;;  %4816 = vmatmul.mubr.msk.f32.gmra.mxu1 %vm1831_vm4, %v2234_v14  ;;  %4841 = vmatmul.mubr.msk.f32.gmra.mxu0 %vm1831_vm4, %v2234_v14  ;;  %v2836_v14 = vld [vmem:[%s6192_s11 + $0x8] sm:$0xff]  ;;  %v4003_v17 = vld [vmem:[%s6192_s11 + $0x50] sm:$0xff] }
 0x51b   : > { %v2235_v19 = vadd.f32 %v2222_v18, %v2107_v16  ;;  %v4004_v16 = vld [vmem:[%s6192_s11 + $0x58] sm:$0xff]  ;;  %v4002_v18 = vld [vmem:[%s6192_s11 + $0x48] sm:$0xff] }
 0x51d   : > { %4818 = vmatprep.mubr.msk.f32.mxu1 %vm1831_vm4, %v2235_v19  ;;  %4843 = vmatprep.mubr.msk.f32.mxu0 %vm1831_vm4, %v2235_v19  ;;  %v4001_v19 = vld [vmem:[%s6192_s11 + $0x40] sm:$0xff] }
 0x51e   : > { %4819 = vmatmul.mubr.msk.f32.gmra.mxu1 %vm1831_vm4, %v2236_v20  ;;  %4844 = vmatmul.mubr.msk.f32.gmra.mxu0 %vm1831_vm4, %v2236_v20 }
 0x51f   : > { %4858 = vmatprep.mubr.msk.f32.mxu1 %vm5097_vm1, %v5096_v50  ;;  %4894 = vmatprep.mubr.msk.f32.mxu0 %vm1607_vm3, %v2659_v45  ;;  %v3382_v45 = vld [vmem:[%s6195_s14 + $0x10] sm:$0xff] }
 0x5d6   : > { %v4814_v21 = vpop.f32.mrf.mxu1  ;;  %v4839_v22 = vpop.f32.mrf.mxu0 }
 0x5d7   : > { %v2463_v37 = vmax.f32 %v4814_v21, %v4839_v22  ;;  %v3997_v21 = vld [vmem:[%s6192_s11 + $0x38] sm:$0xff] }
 0x5d8   : > { %v2329_v23 = vpop.f32.mrf.mxu1  ;;  %v2433_v24 = vpop.f32.mrf.mxu0 }
 0x5d9   : > { %v2462_v38 = vmax.f32 %v2329_v23, %v2433_v24  ;;  %v3996_v23 = vld [vmem:[%s6192_s11 + $0x30] sm:$0xff] }
 0x5da   : > { %v4817_v25 = vpop.f32.mrf.mxu1  ;;  %v4842_v26 = vpop.f32.mrf.mxu0 }
 0x5db   : > { %v2465_v35 = vmax.f32 %v4817_v25, %v4842_v26  ;;  %v3995_v25 = vld [vmem:[%s6192_s11 + $0x28] sm:$0xff] }
 0x5dc   : > { %v2339_v27 = vpop.f32.mrf.mxu1  ;;  %v2443_v28 = vpop.f32.mrf.mxu0 }
 0x5dd   : > { %v2464_v36 = vmax.f32 %v2339_v27, %v2443_v28  ;;  %v3994_v27 = vld [vmem:[%s6192_s11 + $0x20] sm:$0xff] }
 0x5de   : > { %v4820_v29 = vpop.f32.mrf.mxu1  ;;  %v4845_v30 = vpop.f32.mrf.mxu0 }
 0x5df   : > { %v2467_v31 = vmax.f32 %v4820_v29, %v4845_v30 }
 0x5e0   : > { %v2349_v32 = vpop.f32.mrf.mxu1  ;;  %v2453_v33 = vpop.f32.mrf.mxu0 }
 0x5e1   : > { %v2466_v34 = vmax.f32 %v2349_v32, %v2453_v33  ;;  %4847 = vmatpush3.msra.mxu1 %v2467_v31  ;;  %v4011_v32 = vld [vmem:[%s6192_s11 + $0x78] sm:$0xff] }
 0x5e2   : > { %4848 = vmatprep.subr.mxu1 %v5096_v50 }
 0x5e3   : > { %4849 = vmatpush3.msra.mxu1 %v2466_v34 }
 0x5e4   : > { %4850 = vmatprep.subr.mxu1 %v5096_v50 }
 0x5e5   : > { %4851 = vmatpush3.msra.mxu1 %v2465_v35 }
 0x5e6   : > { %4852 = vmatprep.subr.mxu1 %v5096_v50 }
 0x5e7   : > { %4853 = vmatpush3.msra.mxu1 %v2464_v36 }
 0x5e8   : > { %4854 = vmatprep.subr.mxu1 %v5096_v50 }
 0x5e9   : > { %4855 = vmatpush3.msra.mxu1 %v2463_v37 }
 0x5ea   : > { %4856 = vmatprep.subr.mxu1 %v5096_v50 }
 0x5eb   : > { %4857 = vmatpush3.msra.mxu1 %v2462_v38 }
 0x5ec   : > { %4859 = vmatmul.mubr.msk.f32.vlgmr.msra.gmra.mxu1 %vm1400_vm2, %v2468_v39  ;;  %4867 = vmatprep.subr.mxu1 %v5096_v50 }
 0x5ed   : > { %4868 = vmatpush3.msra.mxu1 %v2467_v31  ;;  %4861 = vmatprep.mubr.msk.f32.mxu1 %vm5097_vm1, %v5096_v50 }
 0x5ee   : > { %4869 = vmatprep.subr.mxu1 %v5096_v50 }
 0x5ef   : > { %4870 = vmatpush3.msra.mxu1 %v2466_v34  ;;  %v4010_v34 = vld [vmem:[%s6192_s11 + $0x70] sm:$0xff] }
 0x5f0   : > { %4862 = vmatmul.mubr.msk.f32.gmra.mxu1 %vm1400_vm2, %v2469_v40  ;;  %4871 = vmatprep.subr.mxu1 %v5096_v50  ;;  %v3241_v40 = vld [vmem:[%s6194_s13] sm:$0xff] }
 0x5f1   : > { %4872 = vmatpush3.msra.mxu1 %v2465_v35  ;;  %4864 = vmatprep.mubr.msk.f32.mxu1 %vm5097_vm1, %v5096_v50 }
 0x5f2   : > { %4873 = vmatprep.subr.mxu1 %v5096_v50 }
 0x5f3   : > { %4874 = vmatpush3.msra.mxu1 %v2464_v36  ;;  %v4009_v36 = vld [vmem:[%s6192_s11 + $0x68] sm:$0xff] }
 0x5f4   : > { %4865 = vmatmul.mubr.msk.f32.gmra.mxu1 %vm1400_vm2, %v2470_v41  ;;  %4875 = vmatprep.subr.mxu1 %v5096_v50  ;;  %v3387_v41 = vld [vmem:[%s6195_s14 + $0x38] sm:$0xff] }
 0x5f5   : > { %4876 = vmatpush3.msra.mxu1 %v2463_v37  ;;  %4879 = vmatprep.mubr.msk.f32.mxu1 %vm5097_vm1, %v5096_v50  ;;  %v4008_v37 = vld [vmem:[%s6192_s11 + $0x60] sm:$0xff] }
 0x5f6   : > { %4877 = vmatprep.subr.mxu1 %v5096_v50 }
 0x5f7   : > { %4878 = vmatpush3.msra.mxu1 %v2462_v38 }
 0x5f8   : > { %4880 = vmatmul.mubr.msk.f32.vlgmr.msra.gmra.mxu1 %vm1400_vm2, %v3973_v42  ;;  %4912 = vmatprep.subr.mxu1 %v5096_v50  ;;  %v3386_v42 = vld [vmem:[%s6195_s14 + $0x30] sm:$0xff] }
 0x5f9   : > { %4882 = vmatprep.mubr.msk.f32.mxu1 %vm5097_vm1, %v5096_v50  ;;  %4913 = vmatpush3.msra.mxu1 %v2838_v46  ;;  %v3381_v46 = vld [vmem:[%s6195_s14 + $0x8] sm:$0xff] }
 0x5fa   : > { %4914 = vmatprep.subr.mxu1 %v5096_v50 }
 0x5fb   : > { %4915 = vmatpush3.msra.mxu1 %v2837_v47 }
 0x5fc   : > { %4883 = vmatmul.mubr.msk.f32.gmra.mxu1 %vm1400_vm2, %v3974_v43  ;;  %4916 = vmatprep.subr.mxu1 %v5096_v50  ;;  %v3384_v43 = vld [vmem:[%s6195_s14 + $0x20] sm:$0xff] }
 0x5fd   : > { %4885 = vmatprep.mubr.msk.f32.mxu1 %vm5097_vm1, %v5096_v50  ;;  %4917 = vmatpush3.msra.mxu1 %v2836_v14 }
 0x5fe   : > { %4918 = vmatprep.subr.mxu1 %v5096_v50 }
 0x5ff   : > { %4919 = vmatpush3.msra.mxu1 %v2835_v15 }
 0x600   : > { %4886 = vmatmul.mubr.msk.f32.gmra.mxu1 %vm1400_vm2, %v3975_v44  ;;  %4929 = vmatprep.subr.mxu1 %v5096_v50  ;;  %v3383_v44 = vld [vmem:[%s6195_s14 + $0x18] sm:$0xff] }
 0x601   : > { %4920 = vmatprep.mubr.msk.f32.mxu1 %vm5097_vm1, %v5096_v50 }
 0x6ac   : > { %v2546_v48 = vpop.f32.mrf.mxu1 }
 0x6ae   : > { %v4860_v49 = vpop.f32.mrf.mxu1 }
 0x6b0   : > { %v2551_v51 = vpop.f32.mrf.mxu1 }
 0x6b2   : > { %v4863_v52 = vpop.f32.mrf.mxu1 }
 0x6b4   : > { %v2556_v53 = vpop.f32.mrf.mxu1 }
 0x6b6   : > { %v4866_v54 = vpop.f32.mrf.mxu1 }
 0x6b8   : > { %v2639_v55 = vpop.f32.mrf.mxu1 }
 0x6b9   : > { %v2653_v63 = vmax.f32 %v2546_v48, %v2639_v55 }
 0x6ba   : > { %v4881_v56 = vpop.f32.mrf.mxu1 }
 0x6bb   : > { %v2656_v2 = vmax.f32 %v2653_v63, 0.0 }
 0x6bc   : > { %v2644_v57 = vpop.f32.mrf.mxu1 }
 0x6bd   : > { %v2654_v60 = vmax.f32 %v2551_v51, %v2644_v57 }
 0x6be   : > { %v4884_v58 = vpop.f32.mrf.mxu1 }
 0x6bf   : > { %v2657_v1 = vmax.f32 %v2654_v60, 0.0 }
 0x6c0   : > { %v2649_v59 = vpop.f32.mrf.mxu1 }
 0x6c1   : > { %v2655_v61 = vmax.f32 %v2556_v53, %v2649_v59 }
 0x6c2   : > { %v4887_v62 = vpop.f32.mrf.mxu1 }
 0x6c3   : > { %v2658_v0 = vmax.f32 %v2655_v61, 0.0  ;;  %v2942_v62 = vpop.permute.xlu0 %2941 }
 0x6c5   : > { %4888 = vmatprep.subr.mxu0 %v2658_v0 }
 0x6c6   : > { %4889 = vmatpush3.msra.mxu0 %v2658_v0 }
 0x6c7   : > { %4890 = vmatprep.subr.mxu0 %v2657_v1 }
 0x6c8   : > { %4891 = vmatpush3.msra.mxu0 %v2657_v1 }
 0x6c9   : > { %4892 = vmatprep.subr.mxu0 %v2656_v2 }
 0x6ca   : > { %4893 = vmatpush3.msra.mxu0 %v2656_v2 }
 0x6cb   : > { %4895 = vmatmul.mubr.msk.f32.vlgmr.msra.gmra.mxu0 %vm1607_vm3, %v2660_v3  ;;  %4946 = vmatprep.subr.mxu0 %v5096_v50  ;;  %v2937_v3 = vpop.permute.xlu1 %2936 }
 0x6cc   : > { %4897 = vmatprep.mubr.msk.f32.mxu0 %vm1607_vm3, %v2661_v4  ;;  %4947 = vmatpush3.msra.mxu0 %v4004_v16 }
 0x6cd   : > { %4948 = vmatprep.subr.mxu0 %v5096_v50 }
 0x6ce   : > { %4949 = vmatpush3.msra.mxu0 %v4003_v17 }
 0x6cf   : > { %4898 = vmatmul.mubr.msk.f32.gmra.mxu0 %vm1607_vm3, %v2662_v5  ;;  %4950 = vmatprep.subr.mxu0 %v5096_v50 }
 0x6d0   : > { %4900 = vmatprep.mubr.msk.f32.mxu0 %vm1607_vm3, %v2663_v6  ;;  %4951 = vmatpush3.msra.mxu0 %v4002_v18 }
 0x6d1   : > { %4952 = vmatprep.subr.mxu0 %v5096_v50 }
 0x6d2   : > { %4953 = vmatpush3.msra.mxu0 %v4001_v19 }
 0x6d3   : > { %4901 = vmatmul.mubr.msk.f32.gmra.mxu0 %vm1607_vm3, %v2664_v7  ;;  %v2932_v7 = vpop.permute.xlu0 %2931 }
 0x6d4   : > { %4903 = vmatprep.mubr.msk.f32.mxu0 %vm1607_vm3, %v2665_v8 }
 0x6d7   : > { %4904 = vmatmul.mubr.msk.f32.gmra.mxu0 %vm1607_vm3, %v2666_v9 }
 0x6d8   : > { %4906 = vmatprep.mubr.msk.f32.mxu0 %vm1607_vm3, %v2667_v10 }
 0x6db   : > { %4907 = vmatmul.mubr.msk.f32.gmra.mxu0 %vm1607_vm3, %v2668_v11 }
 0x6dc   : > { %4909 = vmatprep.mubr.msk.f32.mxu0 %vm1607_vm3, %v2669_v12 }
 0x6df   : > { %4910 = vmatmul.mubr.msk.f32.gmra.mxu0 %vm1607_vm3, %v2670_v13 }
 0x6e0   : > { %4954 = vmatprep.mubr.msk.f32.mxu0 %vm5097_vm1, %v5096_v50 }
 0x78b   : > { %v4896_v20 = vpop.f32.mrf.mxu0 }
 0x78d   : > { %v2773_v22 = vpop.f32.mrf.mxu0 }
 0x78e   : > { %4921 = vmatmul.mubr.msk.f32.vlgmr.msra.gmra.mxu1 %vm2839_vm5, %v2773_v22 }
 0x78f   : > { %v4899_v24 = vpop.f32.mrf.mxu0  ;;  %4923 = vmatprep.mubr.msk.f32.mxu1 %vm5097_vm1, %v5096_v50  ;;  %4930 = vmatpush3.msra.mxu1 %v3997_v21 }
 0x790   : > { %4931 = vmatprep.subr.mxu1 %v5096_v50 }
 0x791   : > { %v2783_v26 = vpop.f32.mrf.mxu0  ;;  %4932 = vmatpush3.msra.mxu1 %v3996_v23 }
 0x792   : > { %4924 = vmatmul.mubr.msk.f32.gmra.mxu1 %vm2839_vm5, %v4896_v20  ;;  %4933 = vmatprep.subr.mxu1 %v5096_v50 }
 0x793   : > { %v4902_v28 = vpop.f32.mrf.mxu0  ;;  %4926 = vmatprep.mubr.msk.f32.mxu1 %vm5097_vm1, %v5096_v50  ;;  %4934 = vmatpush3.msra.mxu1 %v3995_v25 }
 0x794   : > { %4935 = vmatprep.subr.mxu1 %v5096_v50 }
 0x795   : > { %v2793_v29 = vpop.f32.mrf.mxu0  ;;  %4936 = vmatpush3.msra.mxu1 %v3994_v27  ;;  %v4032_v27 = vld [vmem:[%s6195_s14 + $0x78] sm:$0xff] }
 0x796   : > { %4927 = vmatmul.mubr.msk.f32.gmra.mxu1 %vm2839_vm5, %v2783_v26  ;;  %4963 = vmatprep.subr.mxu1 %v5096_v50  ;;  %v3242_v26 = vld [vmem:[%s6194_s13 + $0x8] sm:$0xff] }
 0x797   : > { %v4905_v30 = vpop.f32.mrf.mxu0  ;;  %4937 = vmatprep.mubr.msk.f32.mxu1 %vm5097_vm1, %v5096_v50 }
 0x799   : > { %v2803_v31 = vpop.f32.mrf.mxu0 }
 0x79a   : > { %4938 = vmatmul.mubr.msk.f32.vlgmr.msra.gmra.mxu1 %vm2839_vm5, %v4899_v24  ;;  %4955 = vmatmul.mubr.msk.f32.vlgmr.msra.gmra.mxu0 %vm2839_vm5, %v2803_v31  ;;  %v4030_v31 = vld [vmem:[%s6195_s14 + $0x68] sm:$0xff] }
 0x79b   : > { %4940 = vmatprep.mubr.msk.f32.mxu1 %vm5097_vm1, %v5096_v50  ;;  %4957 = vmatprep.mubr.msk.f32.mxu0 %vm5097_vm1, %v5096_v50  ;;  %v4908_v33 = vpop.f32.mrf.mxu0 }
 0x79c   : > { %4964 = vmatpush3.msra.mxu1 %v4011_v32  ;;  %v3245_v32 = vld [vmem:[%s6194_s13 + $0x20] sm:$0xff] }
 0x79d   : > { %4965 = vmatprep.subr.mxu1 %v5096_v50  ;;  %v2813_v35 = vpop.f32.mrf.mxu0 }
 0x79e   : > { %4941 = vmatmul.mubr.msk.f32.gmra.mxu1 %vm2839_vm5, %v2793_v29  ;;  %4958 = vmatmul.mubr.msk.f32.gmra.mxu0 %vm2839_vm5, %v4905_v30  ;;  %v4031_v29 = vld [vmem:[%s6195_s14 + $0x70] sm:$0xff]  ;;  %v3244_v30 = vld [vmem:[%s6194_s13 + $0x18] sm:$0xff] }
 0x79f   : > { %4943 = vmatprep.mubr.msk.f32.mxu1 %vm5097_vm1, %v5096_v50  ;;  %4960 = vmatprep.mubr.msk.f32.mxu0 %vm5097_vm1, %v5096_v50  ;;  %v4911_v38 = vpop.f32.mrf.mxu0 }
 0x7a0   : > { %4966 = vmatpush3.msra.mxu1 %v4010_v34  ;;  %v3246_v34 = vld [vmem:[%s6194_s13 + $0x28] sm:$0xff] }
 0x7a1   : > { %4967 = vmatprep.subr.mxu1 %v5096_v50  ;;  %v2823_v39 = vpop.f32.mrf.mxu0 }
 0x7a2   : > { %4944 = vmatmul.mubr.msk.f32.gmra.mxu1 %vm2839_vm5, %v4902_v28  ;;  %4961 = vmatmul.mubr.msk.f32.gmra.mxu0 %vm2839_vm5, %v2813_v35  ;;  %v3243_v28 = vld [vmem:[%s6194_s13 + $0x10] sm:$0xff]  ;;  %v4028_v35 = vld [vmem:[%s6195_s14 + $0x58] sm:$0xff] }
 0x7a3   : > { %4968 = vmatpush3.msra.mxu1 %v4009_v36  ;;  %4971 = vmatprep.mubr.msk.f32.mxu1 %vm5097_vm1, %v5096_v50  ;;  %v3247_v36 = vld [vmem:[%s6194_s13 + $0x30] sm:$0xff] }
 0x7a4   : > { %4969 = vmatprep.subr.mxu1 %v5096_v50  ;;  %4986 = vmatprep.mubr.msk.f32.mxu0 %vm1607_vm3, %v3241_v40  ;;  %v4026_v40 = vld [vmem:[%s6195_s14 + $0x48] sm:$0xff] }
 0x7a5   : > { %4970 = vmatpush3.msra.mxu1 %v4008_v37  ;;  %v3248_v37 = vld [vmem:[%s6194_s13 + $0x38] sm:$0xff] }
 0x7a6   : > { %4972 = vmatmul.mubr.msk.f32.vlgmr.msra.gmra.mxu1 %vm2839_vm5, %v4908_v33  ;;  %4998 = vmatprep.subr.mxu1 %v3387_v41  ;;  %v4029_v33 = vld [vmem:[%s6195_s14 + $0x60] sm:$0xff] }
 0x7a7   : > { %4974 = vmatprep.mubr.msk.f32.mxu1 %vm5097_vm1, %v5096_v50  ;;  %4999 = vmatpush3.msra.mxu1 %v3387_v41  ;;  %v4042_v41 = vld [vmem:[%s6195_s14 + $0xb8] sm:$0xff] }
 0x7a8   : > { %5000 = vmatprep.subr.mxu1 %v3386_v42 }
 0x7a9   : > { %5001 = vmatpush3.msra.mxu1 %v3386_v42  ;;  %v4025_v42 = vld [vmem:[%s6195_s14 + $0x40] sm:$0xff] }
 0x7aa   : > { %4975 = vmatmul.mubr.msk.f32.gmra.mxu1 %vm2839_vm5, %v2823_v39  ;;  %v4027_v39 = vld [vmem:[%s6195_s14 + $0x50] sm:$0xff] }
 0x7ab   : > { %4977 = vmatprep.mubr.msk.f32.mxu1 %vm5097_vm1, %v5096_v50  ;;  %v3385_v50 = vld [vmem:[%s6195_s14 + $0x28] sm:$0xff] }
 0x7ac   : > { %5002 = vmatprep.subr.mxu1 %v3385_v50 }
 0x7ad   : > { %5003 = vmatpush3.msra.mxu1 %v3385_v50  ;;  %v4052_v50 = vld [vmem:[%s6195_s14 + $0xf8] sm:$0xff] }
 0x7ae   : > { %4978 = vmatmul.mubr.msk.f32.gmra.mxu1 %vm2839_vm5, %v4911_v38  ;;  %5004 = vmatprep.subr.mxu1 %v3384_v43  ;;  %v3380_v38 = vld [vmem:[%s6195_s14] sm:$0xff] }
 0x7af   : > { %5005 = vmatpush3.msra.mxu1 %v3384_v43 }
 0x7b0   : > { %5006 = vmatprep.subr.mxu1 %v3383_v44 }
 0x7b1   : > { %5007 = vmatpush3.msra.mxu1 %v3383_v44 }
 0x7b2   : > { %5008 = vmatprep.subr.mxu1 %v3382_v45 }
 0x7b3   : > { %5009 = vmatpush3.msra.mxu1 %v3382_v45  ;;  %v4041_v45 = vld [vmem:[%s6195_s14 + $0xb0] sm:$0xff] }
 0x7b4   : > { %5010 = vmatprep.subr.mxu1 %v3381_v46 }
 0x7b5   : > { %5011 = vmatpush3.msra.mxu1 %v3381_v46 }
 0x7b6   : > { %5012 = vmatprep.subr.mxu1 %v3380_v38 }
 0x7b7   : > { %5013 = vmatpush3.msra.mxu1 %v3380_v38 }
 0x7b8   : > { %5036 = vmatprep.subr.mxu1 %v4042_v41 }
 0x84e   : > { %v2915_v47 = vpop.f32.mrf.mxu1 }
 0x84f   : > { %v2944_v9 = vadd.f32 %v2932_v7, %v2915_v47  ;;  %v4040_v47 = vld [vmem:[%s6195_s14 + $0xa8] sm:$0xff] }
 0x850   : > { %v4922_v48 = vpop.f32.mrf.mxu1 }
 0x852   : > { %v2920_v49 = vpop.f32.mrf.mxu1 }
 0x853   : > { %v2945_v5 = vadd.f32 %v2937_v3, %v2920_v49  ;;  %v4039_v49 = vld [vmem:[%s6195_s14 + $0xa0] sm:$0xff] }
 0x854   : > { %v4925_v51 = vpop.f32.mrf.mxu1 }
 0x855   : > { %v4051_v51 = vld [vmem:[%s6195_s14 + $0xf0] sm:$0xff] }
 0x856   : > { %v2925_v52 = vpop.f32.mrf.mxu1 }
 0x857   : > { %v2946_v6 = vadd.f32 %v2942_v62, %v2925_v52  ;;  %v4047_v62 = vld [vmem:[%s6195_s14 + $0xd0] sm:$0xff] }
 0x858   : > { %v4928_v53 = vpop.f32.mrf.mxu1 }
 0x859   : > { %v4038_v53 = vld [vmem:[%s6195_s14 + $0x98] sm:$0xff] }
 0x85a   : > { %v3027_v54 = vpop.f32.mrf.mxu1  ;;  %v3124_v55 = vpop.f32.mrf.mxu0 }
 0x85b   : > { %v3041_v13 = vadd.f32 %v3027_v54, %v2944_v9  ;;  %v4050_v54 = vld [vmem:[%s6195_s14 + $0xe8] sm:$0xff] }
 0x85c   : > { %v4939_v56 = vpop.f32.mrf.mxu1  ;;  %v4956_v57 = vpop.f32.mrf.mxu0 }
 0x85d   : > { %v3138_v18 = vadd.f32 %v3124_v55, %v3041_v13  ;;  %v4037_v56 = vld [vmem:[%s6195_s14 + $0x90] sm:$0xff]  ;;  %v4049_v57 = vld [vmem:[%s6195_s14 + $0xe0] sm:$0xff] }
 0x85e   : > { %v3032_v58 = vpop.f32.mrf.mxu1  ;;  %v3129_v59 = vpop.f32.mrf.mxu0 }
 0x85f   : > { %v3042_v10 = vadd.f32 %v3032_v58, %v2945_v5  ;;  %v4036_v58 = vld [vmem:[%s6195_s14 + $0x88] sm:$0xff]  ;;  %v3477_v5 = vpop.permute.xlu0 %3476 }
 0x860   : > { %v4942_v60 = vpop.f32.mrf.mxu1  ;;  %v4959_v61 = vpop.f32.mrf.mxu0 }
 0x861   : > { %v3139_v15 = vadd.f32 %v3129_v59, %v3042_v10  ;;  %v4048_v59 = vld [vmem:[%s6195_s14 + $0xd8] sm:$0xff]  ;;  %v4035_v61 = vld [vmem:[%s6195_s14 + $0x80] sm:$0xff] }
 0x862   : > { %v3037_v63 = vpop.f32.mrf.mxu1  ;;  %v3134_v0 = vpop.f32.mrf.mxu0 }
 0x863   : > { %v3043_v11 = vadd.f32 %v3037_v63, %v2946_v6  ;;  %v4046_v63 = vld [vmem:[%s6195_s14 + $0xc8] sm:$0xff] }
 0x864   : > { %v4945_v1 = vpop.f32.mrf.mxu1  ;;  %v4962_v2 = vpop.f32.mrf.mxu0 }
 0x865   : > { %v3140_v16 = vadd.f32 %v3134_v0, %v3043_v11  ;;  %v4045_v1 = vld [vmem:[%s6195_s14 + $0xc0] sm:$0xff] }
 0x866   : > { %v3221_v4 = vpop.f32.mrf.mxu1 }
 0x867   : > { %v3235_v22 = vadd.f32 %v3221_v4, %v3138_v18 }
 0x868   : > { %v4973_v8 = vpop.f32.mrf.mxu1 }
 0x869   : > { %v3238_v25 = vmax.f32 %v3235_v22, 0.0  ;;  %v3472_v8 = vpop.permute.xlu1 %3471 }
 0x86a   : > { %v3226_v12 = vpop.f32.mrf.mxu1 }
 0x86b   : > { %v3236_v19 = vadd.f32 %v3226_v12, %v3139_v15 }
 0x86c   : > { %v4976_v14 = vpop.f32.mrf.mxu1 }
 0x86d   : > { %v3239_v24 = vmax.f32 %v3236_v19, 0.0 }
 0x86e   : > { %v3231_v17 = vpop.f32.mrf.mxu1 }
 0x86f   : > { %v3237_v20 = vadd.f32 %v3231_v17, %v3140_v16 }
 0x870   : > { %v4979_v21 = vpop.f32.mrf.mxu1 }
 0x871   : > { %v3240_v23 = vmax.f32 %v3237_v20, 0.0 }
 0x873   : > { %4980 = vmatprep.subr.mxu0 %v3240_v23 }
 0x874   : > { %4981 = vmatpush3.msra.mxu0 %v3240_v23 }
 0x875   : > { %4982 = vmatprep.subr.mxu0 %v3239_v24 }
 0x876   : > { %4983 = vmatpush3.msra.mxu0 %v3239_v24 }
 0x877   : > { %4984 = vmatprep.subr.mxu0 %v3238_v25 }
 0x878   : > { %4985 = vmatpush3.msra.mxu0 %v3238_v25 }
 0x879   : > { %4987 = vmatmul.mubr.msk.f32.vlgmr.msra.gmra.mxu0 %vm1607_vm3, %v3242_v26  ;;  %5017 = vmatprep.subr.mxu0 %v4032_v27 }
 0x87a   : > { %4989 = vmatprep.mubr.msk.f32.mxu0 %vm1607_vm3, %v3243_v28  ;;  %5018 = vmatpush3.msra.mxu0 %v4032_v27 }
 0x87b   : > { %5019 = vmatprep.subr.mxu0 %v4031_v29 }
 0x87c   : > { %5020 = vmatpush3.msra.mxu0 %v4031_v29 }
 0x87d   : > { %4990 = vmatmul.mubr.msk.f32.gmra.mxu0 %vm1607_vm3, %v3244_v30  ;;  %5021 = vmatprep.subr.mxu0 %v4030_v31 }
 0x87e   : > { %4992 = vmatprep.mubr.msk.f32.mxu0 %vm1607_vm3, %v3245_v32  ;;  %5022 = vmatpush3.msra.mxu0 %v4030_v31 }
 0x87f   : > { %5023 = vmatprep.subr.mxu0 %v4029_v33 }
 0x880   : > { %5024 = vmatpush3.msra.mxu0 %v4029_v33 }
 0x881   : > { %4993 = vmatmul.mubr.msk.f32.gmra.mxu0 %vm1607_vm3, %v3246_v34  ;;  %5025 = vmatprep.subr.mxu0 %v4028_v35 }
 0x882   : > { %4995 = vmatprep.mubr.msk.f32.mxu0 %vm1607_vm3, %v3247_v36  ;;  %5026 = vmatpush3.msra.mxu0 %v4028_v35 }
 0x883   : > { %5027 = vmatprep.subr.mxu0 %v4027_v39 }
 0x884   : > { %5028 = vmatpush3.msra.mxu0 %v4027_v39 }
 0x885   : > { %4996 = vmatmul.mubr.msk.f32.gmra.mxu0 %vm1607_vm3, %v3248_v37  ;;  %5029 = vmatprep.subr.mxu0 %v4026_v40 }
 0x886   : > { %5030 = vmatpush3.msra.mxu0 %v4026_v40 }
 0x887   : > { %5031 = vmatprep.subr.mxu0 %v4025_v42 }
 0x888   : > { %5032 = vmatpush3.msra.mxu0 %v4025_v42 }
 0x889   : > { %5055 = vmatprep.subr.mxu0 %v4052_v50 }
 0x939   : > { %v4988_v43 = vpop.f32.mrf.mxu0 }
 0x93b   : > { %v3339_v44 = vpop.f32.mrf.mxu0 }
 0x93c   : > { %5014 = vmatprep.mubr.msk.f32.mxu1 %vm1831_vm4, %v3339_v44 }
 0x93d   : > { %v4991_v46 = vpop.f32.mrf.mxu0  ;;  %5015 = vmatmul.mubr.msk.f32.vlgmr.msra.gmra.mxu1 %vm1831_vm4, %v4988_v43 }
 0x93e   : > { %5037 = vmatpush3.msra.mxu1 %v4042_v41 }
 0x93f   : > { %5038 = vmatprep.subr.mxu1 %v4041_v45  ;;  %v3349_v48 = vpop.f32.mrf.mxu0 }
 0x940   : > { %5039 = vmatpush3.msra.mxu1 %v4041_v45  ;;  %5033 = vmatprep.mubr.msk.f32.mxu0 %vm1831_vm4, %v3349_v48 }
 0x941   : > { %5040 = vmatprep.subr.mxu1 %v4040_v47  ;;  %5034 = vmatmul.mubr.msk.f32.vlgmr.msra.gmra.mxu0 %vm1831_vm4, %v4991_v46  ;;  %v4994_v52 = vpop.f32.mrf.mxu0 }
 0x942   : > { %5041 = vmatpush3.msra.mxu1 %v4040_v47  ;;  %5056 = vmatpush3.msra.mxu0 %v4052_v50 }
 0x943   : > { %5042 = vmatprep.subr.mxu1 %v4039_v49  ;;  %5057 = vmatprep.subr.mxu0 %v4051_v51  ;;  %v3359_v55 = vpop.f32.mrf.mxu0 }
 0x944   : > { %5043 = vmatpush3.msra.mxu1 %v4039_v49  ;;  %5058 = vmatpush3.msra.mxu0 %v4051_v51 }
 0x945   : > { %5044 = vmatprep.subr.mxu1 %v4038_v53  ;;  %5059 = vmatprep.subr.mxu0 %v4050_v54  ;;  %v4997_v60 = vpop.f32.mrf.mxu0 }
 0x946   : > { %5045 = vmatpush3.msra.mxu1 %v4038_v53  ;;  %5060 = vmatpush3.msra.mxu0 %v4050_v54 }
 0x947   : > { %5046 = vmatprep.subr.mxu1 %v4037_v56  ;;  %5061 = vmatprep.subr.mxu0 %v4049_v57  ;;  %v3369_v0 = vpop.f32.mrf.mxu0 }
 0x948   : > { %5047 = vmatpush3.msra.mxu1 %v4037_v56  ;;  %5062 = vmatpush3.msra.mxu0 %v4049_v57 }
 0x949   : > { %5048 = vmatprep.subr.mxu1 %v4036_v58  ;;  %5063 = vmatprep.subr.mxu0 %v4048_v59 }
 0x94a   : > { %5049 = vmatpush3.msra.mxu1 %v4036_v58  ;;  %5064 = vmatpush3.msra.mxu0 %v4048_v59 }
 0x94b   : > { %5050 = vmatprep.subr.mxu1 %v4035_v61  ;;  %5065 = vmatprep.subr.mxu0 %v4047_v62 }
 0x94c   : > { %5051 = vmatpush3.msra.mxu1 %v4035_v61  ;;  %5052 = vmatprep.mubr.msk.f32.mxu1 %vm1831_vm4, %v3359_v55 }
 0x94d   : > { %5066 = vmatpush3.msra.mxu0 %v4047_v62  ;;  %5053 = vmatmul.mubr.msk.f32.vlgmr.msra.gmra.mxu1 %vm1831_vm4, %v4994_v52 }
 0x94e   : > { %5067 = vmatprep.subr.mxu0 %v4046_v63  ;;  %5071 = vmatprep.mubr.msk.f32.mxu0 %vm1831_vm4, %v3369_v0 }
 0x94f   : > { %5068 = vmatpush3.msra.mxu0 %v4046_v63 }
 0x950   : > { %5069 = vmatprep.subr.mxu0 %v4045_v1 }
 0x951   : > { %5070 = vmatpush3.msra.mxu0 %v4045_v1 }
 0x952   : > { %5072 = vmatmul.mubr.msk.f32.vlgmr.msra.gmra.mxu0 %vm1831_vm4, %v4997_v60 }
 0x9fd   : > { %v5016_v2 = vpop.f32.mrf.mxu1 }
 0x9fe   : > { %v3480_v6 = vadd.f32 %v5016_v2, %v3477_v5 }
 0x9ff   : > { %v3460_v4 = vpop.f32.mrf.mxu1 }
 0xa00   : > { %v3479_v10 = vadd.f32 %v3472_v8, %v3460_v4 }
 0xa01   : > { %v5035_v3 = vpop.f32.mrf.mxu0 }
 0xa02   : > { %v3572_v11 = vadd.f32 %v5035_v3, %v3480_v6 }
 0xa03   : > { %v3562_v9 = vpop.f32.mrf.mxu0 }
 0xa04   : > { %v3571_v13 = vadd.f32 %v3562_v9, %v3479_v10 }
 0xa0d   : > { %v5054_v7 = vpop.f32.mrf.mxu1 }
 0xa0e   : > { %v3664_v14 = vadd.f32 %v5054_v7, %v3572_v11 }
 0xa0f   : > { %v3654_v12 = vpop.f32.mrf.mxu1 }
 0xa10   : > { %v3663_v16 = vadd.f32 %v3654_v12, %v3571_v13 }
 0xa12   : > { %v5073_v15 = vpop.f32.mrf.mxu0 }
 0xa13   : > { %v3756_v17 = vadd.f32 %v5073_v15, %v3664_v14 }
 0xa14   : > { %v3746_v18 = vpop.f32.mrf.mxu0 }
 0xa15   : > { %3758 = vst [vmem:[%s548_s27 + $0x8] sm:$0xff] %v3756_v17  ;;  %v3755_v19 = vadd.f32 %v3746_v18, %v3663_v16 }
 0xa17   : > { %3757 = vst [vmem:[%s548_s27] sm:$0xff] %v3755_v19 }
 0xa18 PF: > { %s27_s24 = sadd.s32 1, %s5093_s24  }
 0xa19   : > { %p24_p4 = scmp.ge.s32.totalorder %s27_s24, 4  }
 0xa1b   :  { %26 = sbr.rel (!%p24_p4) target bundleno = 3 (0x3), region = 132 }

</bundles_post_ra>
